<compile_context>
chip_gen: v7x
topology: tpu7x:2x2x1
jax: 0.10.0
libtpu: 0.0.40
codegen_flags: <defaults>
</compile_context>

<pallas_src>
import math
import functools

import jax
import jax.numpy as jnp
from jax import lax
from jax.experimental import pallas as pl
from jax.experimental.pallas import tpu as pltpu

# ---- scaled-down ViT-L/14 config -------------------------------------------
IMG = 16            # spatial size (stands in for 224)
PATCH = 4           # patch size   (stands in for 14)
C_IN = 3
D = 32              # hidden dim   (stands in for 1024 == feature_dim)
NH = 2              # heads        (stands in for 16)
DH = D // NH
MLP = 4 * D
DEPTH = 2           # transformer blocks (stands in for 24)
NP = (IMG // PATCH) ** 2
T = NP + 1          # valid tokens = patches + CLS (17)
T_PAD = 24          # tokens padded to a multiple of 8 sublanes
KP = C_IN * PATCH * PATCH   # patch-embed reduction dim (48)
VEC_W = 128         # packed small-vector lane width (>= MLP and 3*D)
N_VEC = 10          # number of packed per-block vectors
EPS = 1e-6


# ---------------------------------------------------------------------------
# In-kernel helpers (elementwise math stays in f32 for v5e compatibility)
# ---------------------------------------------------------------------------
def _layernorm(x, g, b, eps=EPS):
    mu = jnp.mean(x, axis=-1, keepdims=True)
    var = jnp.mean((x - mu) ** 2, axis=-1, keepdims=True)
    return (x - mu) * lax.rsqrt(var + eps) * g + b


def _gelu_tanh(x):
    # TODO(synk): PyTorch nn.GELU default is the exact erf form; the tanh
    # approximation is used here for guaranteed Mosaic lowering.
    c = math.sqrt(2.0 / math.pi)
    return 0.5 * x * (1.0 + jnp.tanh(c * (x + 0.044715 * x * x * x)))


# ---------------------------------------------------------------------------
# The whole model (patch embed + transformer stack + final norm) in one kernel
# ---------------------------------------------------------------------------
def _dinov2_kernel(p_ref, tok_bias_ref, cvec_ref, patch_w_ref,
                   qkv_w_ref, proj_w_ref, fc1_w_ref, fc2_w_ref, vecs_ref,
                   o_ref, qkv_s, attn_s,
                   *, t_pad, t_valid, nh, dh, dm, mlp, depth, kp):
    f32 = jnp.float32
    bf16 = jnp.bfloat16

    cvec = cvec_ref[...]                       # (4, VEC_W) constant vectors
    norm_scale = cvec[0:1, :kp]                # (x/255 - mean)/std fused scale
    norm_shift = cvec[1:2, :kp]                # ... and shift

    # ---- fused ToTensor + Normalize + patch-embed matmul + (pos|CLS|bias) add
    row_ids = lax.broadcasted_iota(jnp.int32, (t_pad, 1), 0)
    is_patch_row = jnp.logical_and(row_ids >= 1, row_ids < t_valid)
    xn = jnp.where(is_patch_row, p_ref[0] * norm_scale - norm_shift, 0.0)
    # tok_bias already holds: row0 = CLS + pos[0]; rows 1..T-1 = pos + conv bias;
    # pad rows = 0.  Zeroed non-patch rows of xn contribute nothing to the dot.
    h = jnp.dot(xn.astype(bf16), patch_w_ref[...],
                preferred_element_type=f32) + tok_bias_ref[...]

    # key-padding bias & softmax scale, hoisted out of the depth/head loops
    key_ids = lax.broadcasted_iota(jnp.int32, (1, t_pad), 1)
    key_bias = jnp.where(key_ids < t_valid, 0.0, -1e30).astype(f32)
    scale = float(dh) ** -0.5

    def block(d, h):
        vec = vecs_ref[d]                      # (N_VEC, VEC_W) packed vectors
        ln1_g, ln1_b = vec[0:1, :dm], vec[1:2, :dm]
        ln2_g, ln2_b = vec[2:3, :dm], vec[3:4, :dm]
        ls1, ls2 = vec[4:5, :dm], vec[5:6, :dm]
        proj_b, fc2_b = vec[6:7, :dm], vec[7:8, :dm]
        fc1_b = vec[8:9, :mlp]
        qkv_b = vec[9:10, :3 * dm]

        # ---- attention: ln1 -> qkv (VMEM scratch) -> per-head softmax(QK^T)V
        #      -> head concat in VMEM scratch -> ONE K=D proj matmul -> LS residual
        y = _layernorm(h, ln1_g, ln1_b)
        qkv_s[...] = jnp.dot(y.astype(bf16), qkv_w_ref[d],
                             preferred_element_type=f32) + qkv_b
        for hh in range(nh):                   # static unroll over heads
            q = qkv_s[:, hh * dh:(hh + 1) * dh]
            k = qkv_s[:, dm + hh * dh:dm + (hh + 1) * dh]
            v = qkv_s[:, 2 * dm + hh * dh:2 * dm + (hh + 1) * dh]
            s = lax.dot_general(q.astype(bf16), k.astype(bf16),
                                (((1,), (1,)), ((), ())),
                                preferred_element_type=f32) * scale + key_bias
            s_max = jnp.max(s, axis=-1, keepdims=True)
            p = jnp.exp(s - s_max)
            p = p * pl.reciprocal(jnp.sum(p, axis=-1, keepdims=True), approx=True)
            attn_s[:, hh * dh:(hh + 1) * dh] = jnp.dot(
                p.astype(bf16), v.astype(bf16), preferred_element_type=f32)
        attn = jnp.dot(attn_s[...].astype(bf16), proj_w_ref[d],
                       preferred_element_type=f32) + proj_b
        h = h + ls1 * attn                     # LayerScale + residual

        # ---- MLP: ln2 -> fc1 + gelu -> fc2 -> LS residual
        y = _layernorm(h, ln2_g, ln2_b)
        z = jnp.dot(y.astype(bf16), fc1_w_ref[d],
                    preferred_element_type=f32) + fc1_b
        z = _gelu_tanh(z)
        z = jnp.dot(z.astype(bf16), fc2_w_ref[d],
                    preferred_element_type=f32) + fc2_b
        return h + ls2 * z

    h = lax.fori_loop(0, depth, block, h, unroll=True)

    # ---- final norm on the CLS row only (LN is per-row, so this equals
    #      norming all tokens and slicing).
    norm_g, norm_b = cvec[2:3, :dm], cvec[3:4, :dm]
    o_ref[...] = _layernorm(h[0:1, :], norm_g, norm_b).reshape(1, 1, dm)


def pallas_dinov2(p_full, params):
    b = p_full.shape[0]
    kernel = functools.partial(_dinov2_kernel, t_pad=T_PAD, t_valid=T, nh=NH,
                               dh=DH, dm=D, mlp=MLP, depth=DEPTH, kp=KP)
    batch3 = lambda bi: (bi, 0, 0)     # only the per-image patch block / output move per step
    fixed2 = lambda bi: (0, 0)         # constant index -> fetched once, not per image
    fixed3 = lambda bi: (0, 0, 0)

    in_specs = [
        pl.BlockSpec((1, T_PAD, KP), batch3),           # per-image patch rows (f32)
        pl.BlockSpec((T_PAD, D), fixed2),               # pos + CLS + conv-bias token bias
        pl.BlockSpec((4, VEC_W), fixed2),               # pixel scale/shift, final norm g/b
        pl.BlockSpec((KP, D), fixed2),                  # patch-embed weight (bf16)
        pl.BlockSpec((DEPTH, D, 3 * D), fixed3),        # qkv weights (bf16)
        pl.BlockSpec((DEPTH, D, D), fixed3),            # proj weights (bf16)
        pl.BlockSpec((DEPTH, D, MLP), fixed3),          # fc1 weights (bf16)
        pl.BlockSpec((DEPTH, MLP, D), fixed3),          # fc2 weights (bf16)
        pl.BlockSpec((DEPTH, N_VEC, VEC_W), fixed3),    # packed per-block vectors (f32)
    ]
    out = pl.pallas_call(
        kernel,
        grid=(b,),
        in_specs=in_specs,
        out_specs=pl.BlockSpec((1, 1, D), batch3),
        out_shape=jax.ShapeDtypeStruct((b, 1, D), jnp.float32),
        scratch_shapes=[pltpu.VMEM((T_PAD, 3 * D), jnp.float32),   # qkv scratch
                        pltpu.VMEM((T_PAD, D), jnp.float32)],      # head-concat scratch
        compiler_params=pltpu.CompilerParams(
            dimension_semantics=("parallel",),
            # NOTE: at real ViT-L size, raise this (and tile fc1/fc2/qkv weight N)
            # so bf16 weight blocks double-buffer within v7x's 64 MiB VMEM.
            vmem_limit_bytes=32 * 1024 * 1024),
    )(p_full, params["tok_bias"], params["const_vecs"], params["patch_w"],
      params["qkv_w"], params["proj_w"], params["fc1_w"], params["fc2_w"],
      params["vecs"])
    return out.reshape(b, D)


# ---------------------------------------------------------------------------
# Parameters (deterministic synthetic init -- NOT a checkpoint load)
# ---------------------------------------------------------------------------
def init_params(key):
    keys = iter(jax.random.split(key, 16))

    def nrm(shape, scale=0.02):
        return scale * jax.random.normal(next(keys), shape, jnp.float32)

    # per-channel (x/255 - mean)/std folded into per-column scale / shift for
    # the fused patch-embed; patch columns are ordered (C, P, P).
    mean = jnp.array([0.485, 0.456, 0.406], jnp.float32)
    std = jnp.array([0.229, 0.224, 0.225], jnp.float32)
    norm_scale = jnp.repeat(1.0 / (255.0 * std), PATCH * PATCH)   # (KP,)
    norm_shift = jnp.repeat(mean / std, PATCH * PATCH)            # (KP,)

    pos = nrm((T, D))
    cls = nrm((1, D))
    patch_b = jnp.zeros((D,), jnp.float32)

    # token bias consumed by the kernel: row0 = CLS + pos[0]; patch rows =
    # pos + conv bias; padded rows stay zero (masked by the key bias).
    tok_bias = jnp.zeros((T_PAD, D), jnp.float32)
    tok_bias = tok_bias.at[0].set(pos[0] + cls[0])
    tok_bias = tok_bias.at[1:T].set(pos[1:] + patch_b)

    # constant vectors packed into one (4, VEC_W) block
    const_vecs = jnp.zeros((4, VEC_W), jnp.float32)
    const_vecs = const_vecs.at[0, :KP].set(norm_scale)
    const_vecs = const_vecs.at[1, :KP].set(norm_shift)
    const_vecs = const_vecs.at[2, :D].set(1.0)     # final norm gamma
    # row 3 (final norm beta) stays zero

    # per-block small vectors packed into one (DEPTH, N_VEC, VEC_W) block:
    # 0 ln1_g | 1 ln1_b | 2 ln2_g | 3 ln2_b | 4 ls1 | 5 ls2 |
    # 6 proj_b | 7 fc2_b | 8 fc1_b | 9 qkv_b
    vecs = jnp.zeros((DEPTH, N_VEC, VEC_W), jnp.float32)
    vecs = vecs.at[:, 0, :D].set(1.0)    # ln1 gamma
    vecs = vecs.at[:, 2, :D].set(1.0)    # ln2 gamma
    vecs = vecs.at[:, 4, :D].set(0.1)    # LayerScale 1 (DINOv2)
    vecs = vecs.at[:, 5, :D].set(0.1)    # LayerScale 2
    # all biases stay zero

    params = {
        "tok_bias": tok_bias,
        "const_vecs": const_vecs,
        "vecs": vecs,
        # matmul weights stored in bf16 (native MXU input dtype)
        "patch_w": nrm((KP, D)).astype(jnp.bfloat16),     # conv(k=stride=PATCH) as matmul
        "qkv_w": nrm((DEPTH, D, 3 * D)).astype(jnp.bfloat16),
        "proj_w": nrm((DEPTH, D, D)).astype(jnp.bfloat16),
        "fc1_w": nrm((DEPTH, D, MLP)).astype(jnp.bfloat16),
        "fc2_w": nrm((DEPTH, MLP, D)).astype(jnp.bfloat16),
    }
    return params


# ---------------------------------------------------------------------------
# Forward pass
# ---------------------------------------------------------------------------
def dinov2_forward(x_img, params):
    b, c, hi, wi = x_img.shape
    hn, wn = hi // PATCH, wi // PATCH

    # TODO(synk): bicubic Resize(224) from PIL has no clean Pallas equivalent;
    # the kernel assumes the input is already at the model's spatial size.

    # patch extraction (one-time layout glue on a tiny tensor)
    patches = x_img.reshape(b, c, hn, PATCH, wn, PATCH)
    patches = patches.transpose(0, 2, 4, 1, 3, 5).reshape(
        b, hn * wn, c * PATCH * PATCH)

    # zero row in the CLS slot + zero pad rows; the kernel masks non-patch rows
    p_full = jnp.concatenate(
        [jnp.zeros((b, 1, KP), jnp.float32), patches,
         jnp.zeros((b, T_PAD - T, KP), jnp.float32)], axis=1)

    # everything else (normalize, patch embed, pos/CLS, all transformer blocks,
    # final norm, CLS extraction) happens inside ONE pallas_call.
    return pallas_dinov2(p_full, params)


# ---------------------------------------------------------------------------
if __name__ == "__main__":
    key = jax.random.PRNGKey(0)
    pkey, xkey = jax.random.split(key)
    params = init_params(pkey)

    # images like the PyTorch module expects: NCHW, pixel values in [0, 255]
    x = jax.random.uniform(xkey, (2, C_IN, IMG, IMG), jnp.float32, 0.0, 255.0)

    out = jax.jit(dinov2_forward)(x, params)
    out = jax.block_until_ready(out)
    assert out.shape == (2, D) and out.dtype == jnp.float32
    assert bool(jnp.all(jnp.isfinite(out)))
    print("KERNEL_OK")
</pallas_src>

<mosaic_0001>
module attributes {stable_mosaic.version = 11 : i64} {
  func.func @_dinov2_kernel(%arg0: i32, %arg1: memref<1x24x48xf32, #tpu.memory_space<vmem>>, %arg2: memref<24x32xf32, #tpu.memory_space<vmem>>, %arg3: memref<4x128xf32, #tpu.memory_space<vmem>>, %arg4: memref<48x32xbf16, #tpu.memory_space<vmem>>, %arg5: memref<2x32x96xbf16, #tpu.memory_space<vmem>>, %arg6: memref<2x32x32xbf16, #tpu.memory_space<vmem>>, %arg7: memref<2x32x128xbf16, #tpu.memory_space<vmem>>, %arg8: memref<2x128x32xbf16, #tpu.memory_space<vmem>>, %arg9: memref<2x10x128xf32, #tpu.memory_space<vmem>>, %arg10: memref<1x1x32xf32, #tpu.memory_space<vmem>>, %arg11: memref<24x96xf32, #tpu.memory_space<vmem>>, %arg12: memref<24x32xf32, #tpu.memory_space<vmem>>) attributes {dimension_semantics = [#tpu.dimension_semantics<parallel>], iteration_bounds = array<i64: 2>, scalar_prefetch = 0 : i64, scratch_operands = 2 : i64, tpu.core_type = #tpu.core_type<tc>, window_params = [{transform_indices = @transform_0, window_bounds = array<i64: 1, 24, 48>}, {pipeline_mode = #tpu.pipeline_mode<synchronous>, transform_indices = @transform_1, window_bounds = array<i64: 24, 32>}, {pipeline_mode = #tpu.pipeline_mode<synchronous>, transform_indices = @transform_2, window_bounds = array<i64: 4, 128>}, {pipeline_mode = #tpu.pipeline_mode<synchronous>, transform_indices = @transform_3, window_bounds = array<i64: 48, 32>}, {pipeline_mode = #tpu.pipeline_mode<synchronous>, transform_indices = @transform_4, window_bounds = array<i64: 2, 32, 96>}, {pipeline_mode = #tpu.pipeline_mode<synchronous>, transform_indices = @transform_5, window_bounds = array<i64: 2, 32, 32>}, {pipeline_mode = #tpu.pipeline_mode<synchronous>, transform_indices = @transform_6, window_bounds = array<i64: 2, 32, 128>}, {pipeline_mode = #tpu.pipeline_mode<synchronous>, transform_indices = @transform_7, window_bounds = array<i64: 2, 128, 32>}, {pipeline_mode = #tpu.pipeline_mode<synchronous>, transform_indices = @transform_8, window_bounds = array<i64: 2, 10, 128>}, {transform_indices = @transform_9, window_bounds = array<i64: 1, 1, 32>}]} {
    %c0 = arith.constant 0 : index
    %c0_0 = arith.constant 0 : index
    %0 = vector.load %arg3[%c0, %c0_0] : memref<4x128xf32, #tpu.memory_space<vmem>>, vector<4x128xf32>
    %1 = vector.extract_strided_slice %0 {offsets = [0, 0], sizes = [1, 48], strides = [1, 1]} : vector<4x128xf32> to vector<1x48xf32>
    %2 = vector.extract_strided_slice %0 {offsets = [1, 0], sizes = [1, 48], strides = [1, 1]} : vector<4x128xf32> to vector<1x48xf32>
    %3 = tpu.iota {dimensions = array<i32: 0>} : vector<24x1xi32>
    %c1_i32 = arith.constant 1 : i32
    %4 = vector.broadcast %c1_i32 : i32 to vector<24x1xi32>
    %5 = arith.cmpi sge, %3, %4 : vector<24x1xi32>
    %c17_i32 = arith.constant 17 : i32
    %6 = vector.broadcast %c17_i32 : i32 to vector<24x1xi32>
    %7 = arith.cmpi slt, %3, %6 : vector<24x1xi32>
    %8 = arith.andi %5, %7 : vector<24x1xi1>
    %c0_1 = arith.constant 0 : index
    %c0_2 = arith.constant 0 : index
    %c0_3 = arith.constant 0 : index
    %9 = vector.load %arg1[%c0_1, %c0_2, %c0_3] : memref<1x24x48xf32, #tpu.memory_space<vmem>>, vector<1x24x48xf32>
    %10 = vector.shape_cast %9 : vector<1x24x48xf32> to vector<24x48xf32>
    %11 = vector.broadcast %1 : vector<1x48xf32> to vector<24x48xf32>
    %12 = arith.mulf %10, %11 : vector<24x48xf32>
    %13 = vector.broadcast %2 : vector<1x48xf32> to vector<24x48xf32>
    %14 = arith.subf %12, %13 : vector<24x48xf32>
    %cst = arith.constant 0.000000e+00 : f32
    %15 = vector.shape_cast %8 : vector<24x1xi1> to vector<24x1xi1>
    %16 = vector.broadcast %15 : vector<24x1xi1> to vector<24x48xi1>
    %17 = vector.broadcast %cst : f32 to vector<24x48xf32>
    %18 = arith.select %16, %14, %17 : vector<24x48xi1>, vector<24x48xf32>
    %19 = arith.truncf %18 : vector<24x48xf32> to vector<24x48xbf16>
    %c0_4 = arith.constant 0 : index
    %c0_5 = arith.constant 0 : index
    %20 = vector.load %arg4[%c0_4, %c0_5] : memref<48x32xbf16, #tpu.memory_space<vmem>>, vector<48x32xbf16>
    %cst_6 = arith.constant dense<0.000000e+00> : vector<24x32xf32>
    %21 = tpu.matmul %19, %20, %cst_6 {dimension_numbers = #tpu.dot_dimension_numbers<[1], [0], [0], [1], [0, 0, 1, 1], [], []>} : vector<24x48xbf16>, vector<48x32xbf16>, vector<24x32xf32> -> vector<24x32xf32>
    %c0_7 = arith.constant 0 : index
    %c0_8 = arith.constant 0 : index
    %22 = vector.load %arg2[%c0_7, %c0_8] : memref<24x32xf32, #tpu.memory_space<vmem>>, vector<24x32xf32>
    %23 = arith.addf %21, %22 : vector<24x32xf32>
    %24 = tpu.iota {dimensions = array<i32: 1>} : vector<1x24xi32>
    %c17_i32_9 = arith.constant 17 : i32
    %25 = vector.broadcast %c17_i32_9 : i32 to vector<1x24xi32>
    %26 = arith.cmpi slt, %24, %25 : vector<1x24xi32>
    %cst_10 = arith.constant 0.000000e+00 : f32
    %cst_11 = arith.constant -1.000000e+30 : f32
    %27 = vector.broadcast %cst_10 : f32 to vector<1x24xf32>
    %28 = vector.broadcast %cst_11 : f32 to vector<1x24xf32>
    %29 = arith.select %26, %27, %28 : vector<1x24xi1>, vector<1x24xf32>
    %c0_i32 = arith.constant 0 : i32
    %30 = arith.index_cast %c0_i32 : i32 to index
    %c0_12 = arith.constant 0 : index
    %c0_13 = arith.constant 0 : index
    %31 = vector.load %arg9[%30, %c0_12, %c0_13] : memref<2x10x128xf32, #tpu.memory_space<vmem>>, vector<1x10x128xf32>
    %32 = vector.shape_cast %31 : vector<1x10x128xf32> to vector<10x128xf32>
    %33 = vector.extract_strided_slice %32 {offsets = [0, 0], sizes = [1, 32], strides = [1, 1]} : vector<10x128xf32> to vector<1x32xf32>
    %34 = vector.extract_strided_slice %32 {offsets = [1, 0], sizes = [1, 32], strides = [1, 1]} : vector<10x128xf32> to vector<1x32xf32>
    %35 = vector.extract_strided_slice %32 {offsets = [2, 0], sizes = [1, 32], strides = [1, 1]} : vector<10x128xf32> to vector<1x32xf32>
    %36 = vector.extract_strided_slice %32 {offsets = [3, 0], sizes = [1, 32], strides = [1, 1]} : vector<10x128xf32> to vector<1x32xf32>
    %37 = vector.extract_strided_slice %32 {offsets = [4, 0], sizes = [1, 32], strides = [1, 1]} : vector<10x128xf32> to vector<1x32xf32>
    %38 = vector.extract_strided_slice %32 {offsets = [5, 0], sizes = [1, 32], strides = [1, 1]} : vector<10x128xf32> to vector<1x32xf32>
    %39 = vector.extract_strided_slice %32 {offsets = [6, 0], sizes = [1, 32], strides = [1, 1]} : vector<10x128xf32> to vector<1x32xf32>
    %40 = vector.extract_strided_slice %32 {offsets = [7, 0], sizes = [1, 32], strides = [1, 1]} : vector<10x128xf32> to vector<1x32xf32>
    %41 = vector.extract_strided_slice %32 {offsets = [8, 0], sizes = [1, 128], strides = [1, 1]} : vector<10x128xf32> to vector<1x128xf32>
    %42 = vector.extract_strided_slice %32 {offsets = [9, 0], sizes = [1, 96], strides = [1, 1]} : vector<10x128xf32> to vector<1x96xf32>
    %cst_14 = arith.constant dense<0.000000e+00> : vector<24xf32>
    %43 = vector.multi_reduction <add>, %23, %cst_14 [1] : vector<24x32xf32> to vector<24xf32>
    %44 = vector.shape_cast %43 : vector<24xf32> to vector<24x1xf32>
    %cst_15 = arith.constant 3.200000e+01 : f32
    %45 = vector.broadcast %cst_15 : f32 to vector<24x1xf32>
    %46 = arith.divf %44, %45 : vector<24x1xf32>
    %47 = vector.broadcast %46 : vector<24x1xf32> to vector<24x32xf32>
    %48 = arith.subf %23, %47 : vector<24x32xf32>
    %49 = arith.mulf %48, %48 : vector<24x32xf32>
    %cst_16 = arith.constant dense<0.000000e+00> : vector<24xf32>
    %50 = vector.multi_reduction <add>, %49, %cst_16 [1] : vector<24x32xf32> to vector<24xf32>
    %51 = vector.shape_cast %50 : vector<24xf32> to vector<24x1xf32>
    %cst_17 = arith.constant 3.200000e+01 : f32
    %52 = vector.broadcast %cst_17 : f32 to vector<24x1xf32>
    %53 = arith.divf %51, %52 : vector<24x1xf32>
    %54 = vector.broadcast %46 : vector<24x1xf32> to vector<24x32xf32>
    %55 = arith.subf %23, %54 : vector<24x32xf32>
    %cst_18 = arith.constant 9.99999997E-7 : f32
    %56 = vector.broadcast %cst_18 : f32 to vector<24x1xf32>
    %57 = arith.addf %53, %56 : vector<24x1xf32>
    %58 = math.rsqrt %57 : vector<24x1xf32>
    %59 = vector.broadcast %58 : vector<24x1xf32> to vector<24x32xf32>
    %60 = arith.mulf %55, %59 : vector<24x32xf32>
    %61 = vector.broadcast %33 : vector<1x32xf32> to vector<24x32xf32>
    %62 = arith.mulf %60, %61 : vector<24x32xf32>
    %63 = vector.broadcast %34 : vector<1x32xf32> to vector<24x32xf32>
    %64 = arith.addf %62, %63 : vector<24x32xf32>
    %65 = arith.truncf %64 : vector<24x32xf32> to vector<24x32xbf16>
    %66 = arith.index_cast %c0_i32 : i32 to index
    %c0_19 = arith.constant 0 : index
    %c0_20 = arith.constant 0 : index
    %67 = vector.load %arg5[%66, %c0_19, %c0_20] : memref<2x32x96xbf16, #tpu.memory_space<vmem>>, vector<1x32x96xbf16>
    %68 = vector.shape_cast %67 : vector<1x32x96xbf16> to vector<32x96xbf16>
    %cst_21 = arith.constant dense<0.000000e+00> : vector<24x96xf32>
    %69 = tpu.matmul %65, %68, %cst_21 {dimension_numbers = #tpu.dot_dimension_numbers<[1], [0], [0], [1], [0, 0, 1, 1], [], []>} : vector<24x32xbf16>, vector<32x96xbf16>, vector<24x96xf32> -> vector<24x96xf32>
    %70 = vector.broadcast %42 : vector<1x96xf32> to vector<24x96xf32>
    %71 = arith.addf %69, %70 : vector<24x96xf32>
    %c0_22 = arith.constant 0 : index
    %c0_23 = arith.constant 0 : index
    %72 = vector.load %arg11[%c0_22, %c0_23] : memref<24x96xf32, #tpu.memory_space<vmem>>, vector<24x96xf32>
    tpu.vector_store %arg11[%c0_22, %c0_23], %71 {strides = array<i32>} : memref<24x96xf32, #tpu.memory_space<vmem>>, vector<24x96xf32>,
    %c0_24 = arith.constant 0 : index
    %c0_25 = arith.constant 0 : index
    %73 = vector.load %arg11[%c0_24, %c0_25] : memref<24x96xf32, #tpu.memory_space<vmem>>, vector<24x16xf32>
    %c0_26 = arith.constant 0 : index
    %c32 = arith.constant 32 : index
    %74 = vector.load %arg11[%c0_26, %c32] : memref<24x96xf32, #tpu.memory_space<vmem>>, vector<24x16xf32>
    %c0_27 = arith.constant 0 : index
    %c64 = arith.constant 64 : index
    %75 = vector.load %arg11[%c0_27, %c64] : memref<24x96xf32, #tpu.memory_space<vmem>>, vector<24x16xf32>
    %76 = arith.truncf %73 : vector<24x16xf32> to vector<24x16xbf16>
    %77 = arith.truncf %74 : vector<24x16xf32> to vector<24x16xbf16>
    %cst_28 = arith.constant dense<0.000000e+00> : vector<24x24xf32>
    %78 = tpu.matmul %76, %77, %cst_28 {dimension_numbers = #tpu.dot_dimension_numbers<[1], [1], [0], [0], [0, 0, 1, 0], [], []>} : vector<24x16xbf16>, vector<24x16xbf16>, vector<24x24xf32> -> vector<24x24xf32>
    %cst_29 = arith.constant 2.500000e-01 : f32
    %79 = vector.broadcast %cst_29 : f32 to vector<24x24xf32>
    %80 = arith.mulf %78, %79 : vector<24x24xf32>
    %81 = vector.broadcast %29 : vector<1x24xf32> to vector<24x24xf32>
    %82 = arith.addf %80, %81 : vector<24x24xf32>
    %cst_30 = arith.constant dense<0xFF800000> : vector<24xf32>
    %83 = vector.multi_reduction <maximumf>, %82, %cst_30 [1] : vector<24x24xf32> to vector<24xf32>
    %84 = vector.shape_cast %83 : vector<24xf32> to vector<24x1xf32>
    %85 = vector.broadcast %84 : vector<24x1xf32> to vector<24x24xf32>
    %86 = arith.subf %82, %85 : vector<24x24xf32>
    %87 = math.exp %86 : vector<24x24xf32>
    %cst_31 = arith.constant dense<0.000000e+00> : vector<24xf32>
    %88 = vector.multi_reduction <add>, %87, %cst_31 [1] : vector<24x24xf32> to vector<24xf32>
    %89 = vector.shape_cast %88 : vector<24xf32> to vector<24x1xf32>
    %90 = tpu.reciprocal %89 {approx = true} : vector<24x1xf32> -> vector<24x1xf32>
    %91 = vector.broadcast %90 : vector<24x1xf32> to vector<24x24xf32>
    %92 = arith.mulf %87, %91 : vector<24x24xf32>
    %93 = arith.truncf %92 : vector<24x24xf32> to vector<24x24xbf16>
    %94 = arith.truncf %75 : vector<24x16xf32> to vector<24x16xbf16>
    %cst_32 = arith.constant dense<0.000000e+00> : vector<24x16xf32>
    %95 = tpu.matmul %93, %94, %cst_32 {dimension_numbers = #tpu.dot_dimension_numbers<[1], [0], [0], [1], [0, 0, 1, 1], [], []>} : vector<24x24xbf16>, vector<24x16xbf16>, vector<24x16xf32> -> vector<24x16xf32>
    %c0_33 = arith.constant 0 : index
    %c0_34 = arith.constant 0 : index
    %96 = vector.load %arg12[%c0_33, %c0_34] : memref<24x32xf32, #tpu.memory_space<vmem>>, vector<24x16xf32>
    tpu.vector_store %arg12[%c0_33, %c0_34], %95 {strides = array<i32>} : memref<24x32xf32, #tpu.memory_space<vmem>>, vector<24x16xf32>,
    %c0_35 = arith.constant 0 : index
    %c16 = arith.constant 16 : index
    %97 = vector.load %arg11[%c0_35, %c16] : memref<24x96xf32, #tpu.memory_space<vmem>>, vector<24x16xf32>
    %c0_36 = arith.constant 0 : index
    %c48 = arith.constant 48 : index
    %98 = vector.load %arg11[%c0_36, %c48] : memref<24x96xf32, #tpu.memory_space<vmem>>, vector<24x16xf32>
    %c0_37 = arith.constant 0 : index
    %c80 = arith.constant 80 : index
    %99 = vector.load %arg11[%c0_37, %c80] : memref<24x96xf32, #tpu.memory_space<vmem>>, vector<24x16xf32>
    %100 = arith.truncf %97 : vector<24x16xf32> to vector<24x16xbf16>
    %101 = arith.truncf %98 : vector<24x16xf32> to vector<24x16xbf16>
    %cst_38 = arith.constant dense<0.000000e+00> : vector<24x24xf32>
    %102 = tpu.matmul %100, %101, %cst_38 {dimension_numbers = #tpu.dot_dimension_numbers<[1], [1], [0], [0], [0, 0, 1, 0], [], []>} : vector<24x16xbf16>, vector<24x16xbf16>, vector<24x24xf32> -> vector<24x24xf32>
    %cst_39 = arith.constant 2.500000e-01 : f32
    %103 = vector.broadcast %cst_39 : f32 to vector<24x24xf32>
    %104 = arith.mulf %102, %103 : vector<24x24xf32>
    %105 = vector.broadcast %29 : vector<1x24xf32> to vector<24x24xf32>
    %106 = arith.addf %104, %105 : vector<24x24xf32>
    %cst_40 = arith.constant dense<0xFF800000> : vector<24xf32>
    %107 = vector.multi_reduction <maximumf>, %106, %cst_40 [1] : vector<24x24xf32> to vector<24xf32>
    %108 = vector.shape_cast %107 : vector<24xf32> to vector<24x1xf32>
    %109 = vector.broadcast %108 : vector<24x1xf32> to vector<24x24xf32>
    %110 = arith.subf %106, %109 : vector<24x24xf32>
    %111 = math.exp %110 : vector<24x24xf32>
    %cst_41 = arith.constant dense<0.000000e+00> : vector<24xf32>
    %112 = vector.multi_reduction <add>, %111, %cst_41 [1] : vector<24x24xf32> to vector<24xf32>
    %113 = vector.shape_cast %112 : vector<24xf32> to vector<24x1xf32>
    %114 = tpu.reciprocal %113 {approx = true} : vector<24x1xf32> -> vector<24x1xf32>
    %115 = vector.broadcast %114 : vector<24x1xf32> to vector<24x24xf32>
    %116 = arith.mulf %111, %115 : vector<24x24xf32>
    %117 = arith.truncf %116 : vector<24x24xf32> to vector<24x24xbf16>
    %118 = arith.truncf %99 : vector<24x16xf32> to vector<24x16xbf16>
    %cst_42 = arith.constant dense<0.000000e+00> : vector<24x16xf32>
    %119 = tpu.matmul %117, %118, %cst_42 {dimension_numbers = #tpu.dot_dimension_numbers<[1], [0], [0], [1], [0, 0, 1, 1], [], []>} : vector<24x24xbf16>, vector<24x16xbf16>, vector<24x16xf32> -> vector<24x16xf32>
    %c0_43 = arith.constant 0 : index
    %c16_44 = arith.constant 16 : index
    %120 = vector.load %arg12[%c0_43, %c16_44] : memref<24x32xf32, #tpu.memory_space<vmem>>, vector<24x16xf32>
    tpu.vector_store %arg12[%c0_43, %c16_44], %119 {strides = array<i32>} : memref<24x32xf32, #tpu.memory_space<vmem>>, vector<24x16xf32>,
    %c0_45 = arith.constant 0 : index
    %c0_46 = arith.constant 0 : index
    %121 = vector.load %arg12[%c0_45, %c0_46] : memref<24x32xf32, #tpu.memory_space<vmem>>, vector<24x32xf32>
    %122 = arith.truncf %121 : vector<24x32xf32> to vector<24x32xbf16>
    %123 = arith.index_cast %c0_i32 : i32 to index
    %c0_47 = arith.constant 0 : index
    %c0_48 = arith.constant 0 : index
    %124 = vector.load %arg6[%123, %c0_47, %c0_48] : memref<2x32x32xbf16, #tpu.memory_space<vmem>>, vector<1x32x32xbf16>
    %125 = vector.shape_cast %124 : vector<1x32x32xbf16> to vector<32x32xbf16>
    %cst_49 = arith.constant dense<0.000000e+00> : vector<24x32xf32>
    %126 = tpu.matmul %122, %125, %cst_49 {dimension_numbers = #tpu.dot_dimension_numbers<[1], [0], [0], [1], [0, 0, 1, 1], [], []>} : vector<24x32xbf16>, vector<32x32xbf16>, vector<24x32xf32> -> vector<24x32xf32>
    %127 = vector.broadcast %39 : vector<1x32xf32> to vector<24x32xf32>
    %128 = arith.addf %126, %127 : vector<24x32xf32>
    %129 = vector.broadcast %37 : vector<1x32xf32> to vector<24x32xf32>
    %130 = arith.mulf %129, %128 : vector<24x32xf32>
    %131 = arith.addf %23, %130 : vector<24x32xf32>
    %cst_50 = arith.constant dense<0.000000e+00> : vector<24xf32>
    %132 = vector.multi_reduction <add>, %131, %cst_50 [1] : vector<24x32xf32> to vector<24xf32>
    %133 = vector.shape_cast %132 : vector<24xf32> to vector<24x1xf32>
    %cst_51 = arith.constant 3.200000e+01 : f32
    %134 = vector.broadcast %cst_51 : f32 to vector<24x1xf32>
    %135 = arith.divf %133, %134 : vector<24x1xf32>
    %136 = vector.broadcast %135 : vector<24x1xf32> to vector<24x32xf32>
    %137 = arith.subf %131, %136 : vector<24x32xf32>
    %138 = arith.mulf %137, %137 : vector<24x32xf32>
    %cst_52 = arith.constant dense<0.000000e+00> : vector<24xf32>
    %139 = vector.multi_reduction <add>, %138, %cst_52 [1] : vector<24x32xf32> to vector<24xf32>
    %140 = vector.shape_cast %139 : vector<24xf32> to vector<24x1xf32>
    %cst_53 = arith.constant 3.200000e+01 : f32
    %141 = vector.broadcast %cst_53 : f32 to vector<24x1xf32>
    %142 = arith.divf %140, %141 : vector<24x1xf32>
    %143 = vector.broadcast %135 : vector<24x1xf32> to vector<24x32xf32>
    %144 = arith.subf %131, %143 : vector<24x32xf32>
    %cst_54 = arith.constant 9.99999997E-7 : f32
    %145 = vector.broadcast %cst_54 : f32 to vector<24x1xf32>
    %146 = arith.addf %142, %145 : vector<24x1xf32>
    %147 = math.rsqrt %146 : vector<24x1xf32>
    %148 = vector.broadcast %147 : vector<24x1xf32> to vector<24x32xf32>
    %149 = arith.mulf %144, %148 : vector<24x32xf32>
    %150 = vector.broadcast %35 : vector<1x32xf32> to vector<24x32xf32>
    %151 = arith.mulf %149, %150 : vector<24x32xf32>
    %152 = vector.broadcast %36 : vector<1x32xf32> to vector<24x32xf32>
    %153 = arith.addf %151, %152 : vector<24x32xf32>
    %154 = arith.truncf %153 : vector<24x32xf32> to vector<24x32xbf16>
    %155 = arith.index_cast %c0_i32 : i32 to index
    %c0_55 = arith.constant 0 : index
    %c0_56 = arith.constant 0 : index
    %156 = vector.load %arg7[%155, %c0_55, %c0_56] : memref<2x32x128xbf16, #tpu.memory_space<vmem>>, vector<1x32x128xbf16>
    %157 = vector.shape_cast %156 : vector<1x32x128xbf16> to vector<32x128xbf16>
    %cst_57 = arith.constant dense<0.000000e+00> : vector<24x128xf32>
    %158 = tpu.matmul %154, %157, %cst_57 {dimension_numbers = #tpu.dot_dimension_numbers<[1], [0], [0], [1], [0, 0, 1, 1], [], []>} : vector<24x32xbf16>, vector<32x128xbf16>, vector<24x128xf32> -> vector<24x128xf32>
    %159 = vector.broadcast %41 : vector<1x128xf32> to vector<24x128xf32>
    %160 = arith.addf %158, %159 : vector<24x128xf32>
    %cst_58 = arith.constant 5.000000e-01 : f32
    %161 = vector.broadcast %cst_58 : f32 to vector<24x128xf32>
    %162 = arith.mulf %161, %160 : vector<24x128xf32>
    %cst_59 = arith.constant 4.471500e-02 : f32
    %163 = vector.broadcast %cst_59 : f32 to vector<24x128xf32>
    %164 = arith.mulf %163, %160 : vector<24x128xf32>
    %165 = arith.mulf %164, %160 : vector<24x128xf32>
    %166 = arith.mulf %165, %160 : vector<24x128xf32>
    %167 = arith.addf %160, %166 : vector<24x128xf32>
    %cst_60 = arith.constant 0.797884583 : f32
    %168 = vector.broadcast %cst_60 : f32 to vector<24x128xf32>
    %169 = arith.mulf %168, %167 : vector<24x128xf32>
    %170 = math.tanh %169 : vector<24x128xf32>
    %cst_61 = arith.constant 1.000000e+00 : f32
    %171 = vector.broadcast %cst_61 : f32 to vector<24x128xf32>
    %172 = arith.addf %171, %170 : vector<24x128xf32>
    %173 = arith.mulf %162, %172 : vector<24x128xf32>
    %174 = arith.truncf %173 : vector<24x128xf32> to vector<24x128xbf16>
    %175 = arith.index_cast %c0_i32 : i32 to index
    %c0_62 = arith.constant 0 : index
    %c0_63 = arith.constant 0 : index
    %176 = vector.load %arg8[%175, %c0_62, %c0_63] : memref<2x128x32xbf16, #tpu.memory_space<vmem>>, vector<1x128x32xbf16>
    %177 = vector.shape_cast %176 : vector<1x128x32xbf16> to vector<128x32xbf16>
    %cst_64 = arith.constant dense<0.000000e+00> : vector<24x32xf32>
    %178 = tpu.matmul %174, %177, %cst_64 {dimension_numbers = #tpu.dot_dimension_numbers<[1], [0], [0], [1], [0, 0, 1, 1], [], []>} : vector<24x128xbf16>, vector<128x32xbf16>, vector<24x32xf32> -> vector<24x32xf32>
    %179 = vector.broadcast %40 : vector<1x32xf32> to vector<24x32xf32>
    %180 = arith.addf %178, %179 : vector<24x32xf32>
    %181 = vector.broadcast %38 : vector<1x32xf32> to vector<24x32xf32>
    %182 = arith.mulf %181, %180 : vector<24x32xf32>
    %183 = arith.addf %131, %182 : vector<24x32xf32>
    %c1_i32_65 = arith.constant 1 : i32
    %184 = arith.index_cast %c1_i32_65 : i32 to index
    %c0_66 = arith.constant 0 : index
    %c0_67 = arith.constant 0 : index
    %185 = vector.load %arg9[%184, %c0_66, %c0_67] : memref<2x10x128xf32, #tpu.memory_space<vmem>>, vector<1x10x128xf32>
    %186 = vector.shape_cast %185 : vector<1x10x128xf32> to vector<10x128xf32>
    %187 = vector.extract_strided_slice %186 {offsets = [0, 0], sizes = [1, 32], strides = [1, 1]} : vector<10x128xf32> to vector<1x32xf32>
    %188 = vector.extract_strided_slice %186 {offsets = [1, 0], sizes = [1, 32], strides = [1, 1]} : vector<10x128xf32> to vector<1x32xf32>
    %189 = vector.extract_strided_slice %186 {offsets = [2, 0], sizes = [1, 32], strides = [1, 1]} : vector<10x128xf32> to vector<1x32xf32>
    %190 = vector.extract_strided_slice %186 {offsets = [3, 0], sizes = [1, 32], strides = [1, 1]} : vector<10x128xf32> to vector<1x32xf32>
    %191 = vector.extract_strided_slice %186 {offsets = [4, 0], sizes = [1, 32], strides = [1, 1]} : vector<10x128xf32> to vector<1x32xf32>
    %192 = vector.extract_strided_slice %186 {offsets = [5, 0], sizes = [1, 32], strides = [1, 1]} : vector<10x128xf32> to vector<1x32xf32>
    %193 = vector.extract_strided_slice %186 {offsets = [6, 0], sizes = [1, 32], strides = [1, 1]} : vector<10x128xf32> to vector<1x32xf32>
    %194 = vector.extract_strided_slice %186 {offsets = [7, 0], sizes = [1, 32], strides = [1, 1]} : vector<10x128xf32> to vector<1x32xf32>
    %195 = vector.extract_strided_slice %186 {offsets = [8, 0], sizes = [1, 128], strides = [1, 1]} : vector<10x128xf32> to vector<1x128xf32>
    %196 = vector.extract_strided_slice %186 {offsets = [9, 0], sizes = [1, 96], strides = [1, 1]} : vector<10x128xf32> to vector<1x96xf32>
    %cst_68 = arith.constant dense<0.000000e+00> : vector<24xf32>
    %197 = vector.multi_reduction <add>, %183, %cst_68 [1] : vector<24x32xf32> to vector<24xf32>
    %198 = vector.shape_cast %197 : vector<24xf32> to vector<24x1xf32>
    %cst_69 = arith.constant 3.200000e+01 : f32
    %199 = vector.broadcast %cst_69 : f32 to vector<24x1xf32>
    %200 = arith.divf %198, %199 : vector<24x1xf32>
    %201 = vector.broadcast %200 : vector<24x1xf32> to vector<24x32xf32>
    %202 = arith.subf %183, %201 : vector<24x32xf32>
    %203 = arith.mulf %202, %202 : vector<24x32xf32>
    %cst_70 = arith.constant dense<0.000000e+00> : vector<24xf32>
    %204 = vector.multi_reduction <add>, %203, %cst_70 [1] : vector<24x32xf32> to vector<24xf32>
    %205 = vector.shape_cast %204 : vector<24xf32> to vector<24x1xf32>
    %cst_71 = arith.constant 3.200000e+01 : f32
    %206 = vector.broadcast %cst_71 : f32 to vector<24x1xf32>
    %207 = arith.divf %205, %206 : vector<24x1xf32>
    %208 = vector.broadcast %200 : vector<24x1xf32> to vector<24x32xf32>
    %209 = arith.subf %183, %208 : vector<24x32xf32>
    %cst_72 = arith.constant 9.99999997E-7 : f32
    %210 = vector.broadcast %cst_72 : f32 to vector<24x1xf32>
    %211 = arith.addf %207, %210 : vector<24x1xf32>
    %212 = math.rsqrt %211 : vector<24x1xf32>
    %213 = vector.broadcast %212 : vector<24x1xf32> to vector<24x32xf32>
    %214 = arith.mulf %209, %213 : vector<24x32xf32>
    %215 = vector.broadcast %187 : vector<1x32xf32> to vector<24x32xf32>
    %216 = arith.mulf %214, %215 : vector<24x32xf32>
    %217 = vector.broadcast %188 : vector<1x32xf32> to vector<24x32xf32>
    %218 = arith.addf %216, %217 : vector<24x32xf32>
    %219 = arith.truncf %218 : vector<24x32xf32> to vector<24x32xbf16>
    %220 = arith.index_cast %c1_i32_65 : i32 to index
    %c0_73 = arith.constant 0 : index
    %c0_74 = arith.constant 0 : index
    %221 = vector.load %arg5[%220, %c0_73, %c0_74] : memref<2x32x96xbf16, #tpu.memory_space<vmem>>, vector<1x32x96xbf16>
    %222 = vector.shape_cast %221 : vector<1x32x96xbf16> to vector<32x96xbf16>
    %cst_75 = arith.constant dense<0.000000e+00> : vector<24x96xf32>
    %223 = tpu.matmul %219, %222, %cst_75 {dimension_numbers = #tpu.dot_dimension_numbers<[1], [0], [0], [1], [0, 0, 1, 1], [], []>} : vector<24x32xbf16>, vector<32x96xbf16>, vector<24x96xf32> -> vector<24x96xf32>
    %224 = vector.broadcast %196 : vector<1x96xf32> to vector<24x96xf32>
    %225 = arith.addf %223, %224 : vector<24x96xf32>
    %c0_76 = arith.constant 0 : index
    %c0_77 = arith.constant 0 : index
    %226 = vector.load %arg11[%c0_76, %c0_77] : memref<24x96xf32, #tpu.memory_space<vmem>>, vector<24x96xf32>
    tpu.vector_store %arg11[%c0_76, %c0_77], %225 {strides = array<i32>} : memref<24x96xf32, #tpu.memory_space<vmem>>, vector<24x96xf32>,
    %c0_78 = arith.constant 0 : index
    %c0_79 = arith.constant 0 : index
    %227 = vector.load %arg11[%c0_78, %c0_79] : memref<24x96xf32, #tpu.memory_space<vmem>>, vector<24x16xf32>
    %c0_80 = arith.constant 0 : index
    %c32_81 = arith.constant 32 : index
    %228 = vector.load %arg11[%c0_80, %c32_81] : memref<24x96xf32, #tpu.memory_space<vmem>>, vector<24x16xf32>
    %c0_82 = arith.constant 0 : index
    %c64_83 = arith.constant 64 : index
    %229 = vector.load %arg11[%c0_82, %c64_83] : memref<24x96xf32, #tpu.memory_space<vmem>>, vector<24x16xf32>
    %230 = arith.truncf %227 : vector<24x16xf32> to vector<24x16xbf16>
    %231 = arith.truncf %228 : vector<24x16xf32> to vector<24x16xbf16>
    %cst_84 = arith.constant dense<0.000000e+00> : vector<24x24xf32>
    %232 = tpu.matmul %230, %231, %cst_84 {dimension_numbers = #tpu.dot_dimension_numbers<[1], [1], [0], [0], [0, 0, 1, 0], [], []>} : vector<24x16xbf16>, vector<24x16xbf16>, vector<24x24xf32> -> vector<24x24xf32>
    %cst_85 = arith.constant 2.500000e-01 : f32
    %233 = vector.broadcast %cst_85 : f32 to vector<24x24xf32>
    %234 = arith.mulf %232, %233 : vector<24x24xf32>
    %235 = vector.broadcast %29 : vector<1x24xf32> to vector<24x24xf32>
    %236 = arith.addf %234, %235 : vector<24x24xf32>
    %cst_86 = arith.constant dense<0xFF800000> : vector<24xf32>
    %237 = vector.multi_reduction <maximumf>, %236, %cst_86 [1] : vector<24x24xf32> to vector<24xf32>
    %238 = vector.shape_cast %237 : vector<24xf32> to vector<24x1xf32>
    %239 = vector.broadcast %238 : vector<24x1xf32> to vector<24x24xf32>
    %240 = arith.subf %236, %239 : vector<24x24xf32>
    %241 = math.exp %240 : vector<24x24xf32>
    %cst_87 = arith.constant dense<0.000000e+00> : vector<24xf32>
    %242 = vector.multi_reduction <add>, %241, %cst_87 [1] : vector<24x24xf32> to vector<24xf32>
    %243 = vector.shape_cast %242 : vector<24xf32> to vector<24x1xf32>
    %244 = tpu.reciprocal %243 {approx = true} : vector<24x1xf32> -> vector<24x1xf32>
    %245 = vector.broadcast %244 : vector<24x1xf32> to vector<24x24xf32>
    %246 = arith.mulf %241, %245 : vector<24x24xf32>
    %247 = arith.truncf %246 : vector<24x24xf32> to vector<24x24xbf16>
    %248 = arith.truncf %229 : vector<24x16xf32> to vector<24x16xbf16>
    %cst_88 = arith.constant dense<0.000000e+00> : vector<24x16xf32>
    %249 = tpu.matmul %247, %248, %cst_88 {dimension_numbers = #tpu.dot_dimension_numbers<[1], [0], [0], [1], [0, 0, 1, 1], [], []>} : vector<24x24xbf16>, vector<24x16xbf16>, vector<24x16xf32> -> vector<24x16xf32>
    %c0_89 = arith.constant 0 : index
    %c0_90 = arith.constant 0 : index
    %250 = vector.load %arg12[%c0_89, %c0_90] : memref<24x32xf32, #tpu.memory_space<vmem>>, vector<24x16xf32>
    tpu.vector_store %arg12[%c0_89, %c0_90], %249 {strides = array<i32>} : memref<24x32xf32, #tpu.memory_space<vmem>>, vector<24x16xf32>,
    %c0_91 = arith.constant 0 : index
    %c16_92 = arith.constant 16 : index
    %251 = vector.load %arg11[%c0_91, %c16_92] : memref<24x96xf32, #tpu.memory_space<vmem>>, vector<24x16xf32>
    %c0_93 = arith.constant 0 : index
    %c48_94 = arith.constant 48 : index
    %252 = vector.load %arg11[%c0_93, %c48_94] : memref<24x96xf32, #tpu.memory_space<vmem>>, vector<24x16xf32>
    %c0_95 = arith.constant 0 : index
    %c80_96 = arith.constant 80 : index
    %253 = vector.load %arg11[%c0_95, %c80_96] : memref<24x96xf32, #tpu.memory_space<vmem>>, vector<24x16xf32>
    %254 = arith.truncf %251 : vector<24x16xf32> to vector<24x16xbf16>
    %255 = arith.truncf %252 : vector<24x16xf32> to vector<24x16xbf16>
    %cst_97 = arith.constant dense<0.000000e+00> : vector<24x24xf32>
    %256 = tpu.matmul %254, %255, %cst_97 {dimension_numbers = #tpu.dot_dimension_numbers<[1], [1], [0], [0], [0, 0, 1, 0], [], []>} : vector<24x16xbf16>, vector<24x16xbf16>, vector<24x24xf32> -> vector<24x24xf32>
    %cst_98 = arith.constant 2.500000e-01 : f32
    %257 = vector.broadcast %cst_98 : f32 to vector<24x24xf32>
    %258 = arith.mulf %256, %257 : vector<24x24xf32>
    %259 = vector.broadcast %29 : vector<1x24xf32> to vector<24x24xf32>
    %260 = arith.addf %258, %259 : vector<24x24xf32>
    %cst_99 = arith.constant dense<0xFF800000> : vector<24xf32>
    %261 = vector.multi_reduction <maximumf>, %260, %cst_99 [1] : vector<24x24xf32> to vector<24xf32>
    %262 = vector.shape_cast %261 : vector<24xf32> to vector<24x1xf32>
    %263 = vector.broadcast %262 : vector<24x1xf32> to vector<24x24xf32>
    %264 = arith.subf %260, %263 : vector<24x24xf32>
    %265 = math.exp %264 : vector<24x24xf32>
    %cst_100 = arith.constant dense<0.000000e+00> : vector<24xf32>
    %266 = vector.multi_reduction <add>, %265, %cst_100 [1] : vector<24x24xf32> to vector<24xf32>
    %267 = vector.shape_cast %266 : vector<24xf32> to vector<24x1xf32>
    %268 = tpu.reciprocal %267 {approx = true} : vector<24x1xf32> -> vector<24x1xf32>
    %269 = vector.broadcast %268 : vector<24x1xf32> to vector<24x24xf32>
    %270 = arith.mulf %265, %269 : vector<24x24xf32>
    %271 = arith.truncf %270 : vector<24x24xf32> to vector<24x24xbf16>
    %272 = arith.truncf %253 : vector<24x16xf32> to vector<24x16xbf16>
    %cst_101 = arith.constant dense<0.000000e+00> : vector<24x16xf32>
    %273 = tpu.matmul %271, %272, %cst_101 {dimension_numbers = #tpu.dot_dimension_numbers<[1], [0], [0], [1], [0, 0, 1, 1], [], []>} : vector<24x24xbf16>, vector<24x16xbf16>, vector<24x16xf32> -> vector<24x16xf32>
    %c0_102 = arith.constant 0 : index
    %c16_103 = arith.constant 16 : index
    %274 = vector.load %arg12[%c0_102, %c16_103] : memref<24x32xf32, #tpu.memory_space<vmem>>, vector<24x16xf32>
    tpu.vector_store %arg12[%c0_102, %c16_103], %273 {strides = array<i32>} : memref<24x32xf32, #tpu.memory_space<vmem>>, vector<24x16xf32>,
    %c0_104 = arith.constant 0 : index
    %c0_105 = arith.constant 0 : index
    %275 = vector.load %arg12[%c0_104, %c0_105] : memref<24x32xf32, #tpu.memory_space<vmem>>, vector<24x32xf32>
    %276 = arith.truncf %275 : vector<24x32xf32> to vector<24x32xbf16>
    %277 = arith.index_cast %c1_i32_65 : i32 to index
    %c0_106 = arith.constant 0 : index
    %c0_107 = arith.constant 0 : index
    %278 = vector.load %arg6[%277, %c0_106, %c0_107] : memref<2x32x32xbf16, #tpu.memory_space<vmem>>, vector<1x32x32xbf16>
    %279 = vector.shape_cast %278 : vector<1x32x32xbf16> to vector<32x32xbf16>
    %cst_108 = arith.constant dense<0.000000e+00> : vector<24x32xf32>
    %280 = tpu.matmul %276, %279, %cst_108 {dimension_numbers = #tpu.dot_dimension_numbers<[1], [0], [0], [1], [0, 0, 1, 1], [], []>} : vector<24x32xbf16>, vector<32x32xbf16>, vector<24x32xf32> -> vector<24x32xf32>
    %281 = vector.broadcast %193 : vector<1x32xf32> to vector<24x32xf32>
    %282 = arith.addf %280, %281 : vector<24x32xf32>
    %283 = vector.broadcast %191 : vector<1x32xf32> to vector<24x32xf32>
    %284 = arith.mulf %283, %282 : vector<24x32xf32>
    %285 = arith.addf %183, %284 : vector<24x32xf32>
    %cst_109 = arith.constant dense<0.000000e+00> : vector<24xf32>
    %286 = vector.multi_reduction <add>, %285, %cst_109 [1] : vector<24x32xf32> to vector<24xf32>
    %287 = vector.shape_cast %286 : vector<24xf32> to vector<24x1xf32>
    %cst_110 = arith.constant 3.200000e+01 : f32
    %288 = vector.broadcast %cst_110 : f32 to vector<24x1xf32>
    %289 = arith.divf %287, %288 : vector<24x1xf32>
    %290 = vector.broadcast %289 : vector<24x1xf32> to vector<24x32xf32>
    %291 = arith.subf %285, %290 : vector<24x32xf32>
    %292 = arith.mulf %291, %291 : vector<24x32xf32>
    %cst_111 = arith.constant dense<0.000000e+00> : vector<24xf32>
    %293 = vector.multi_reduction <add>, %292, %cst_111 [1] : vector<24x32xf32> to vector<24xf32>
    %294 = vector.shape_cast %293 : vector<24xf32> to vector<24x1xf32>
    %cst_112 = arith.constant 3.200000e+01 : f32
    %295 = vector.broadcast %cst_112 : f32 to vector<24x1xf32>
    %296 = arith.divf %294, %295 : vector<24x1xf32>
    %297 = vector.broadcast %289 : vector<24x1xf32> to vector<24x32xf32>
    %298 = arith.subf %285, %297 : vector<24x32xf32>
    %cst_113 = arith.constant 9.99999997E-7 : f32
    %299 = vector.broadcast %cst_113 : f32 to vector<24x1xf32>
    %300 = arith.addf %296, %299 : vector<24x1xf32>
    %301 = math.rsqrt %300 : vector<24x1xf32>
    %302 = vector.broadcast %301 : vector<24x1xf32> to vector<24x32xf32>
    %303 = arith.mulf %298, %302 : vector<24x32xf32>
    %304 = vector.broadcast %189 : vector<1x32xf32> to vector<24x32xf32>
    %305 = arith.mulf %303, %304 : vector<24x32xf32>
    %306 = vector.broadcast %190 : vector<1x32xf32> to vector<24x32xf32>
    %307 = arith.addf %305, %306 : vector<24x32xf32>
    %308 = arith.truncf %307 : vector<24x32xf32> to vector<24x32xbf16>
    %309 = arith.index_cast %c1_i32_65 : i32 to index
    %c0_114 = arith.constant 0 : index
    %c0_115 = arith.constant 0 : index
    %310 = vector.load %arg7[%309, %c0_114, %c0_115] : memref<2x32x128xbf16, #tpu.memory_space<vmem>>, vector<1x32x128xbf16>
    %311 = vector.shape_cast %310 : vector<1x32x128xbf16> to vector<32x128xbf16>
    %cst_116 = arith.constant dense<0.000000e+00> : vector<24x128xf32>
    %312 = tpu.matmul %308, %311, %cst_116 {dimension_numbers = #tpu.dot_dimension_numbers<[1], [0], [0], [1], [0, 0, 1, 1], [], []>} : vector<24x32xbf16>, vector<32x128xbf16>, vector<24x128xf32> -> vector<24x128xf32>
    %313 = vector.broadcast %195 : vector<1x128xf32> to vector<24x128xf32>
    %314 = arith.addf %312, %313 : vector<24x128xf32>
    %cst_117 = arith.constant 5.000000e-01 : f32
    %315 = vector.broadcast %cst_117 : f32 to vector<24x128xf32>
    %316 = arith.mulf %315, %314 : vector<24x128xf32>
    %cst_118 = arith.constant 4.471500e-02 : f32
    %317 = vector.broadcast %cst_118 : f32 to vector<24x128xf32>
    %318 = arith.mulf %317, %314 : vector<24x128xf32>
    %319 = arith.mulf %318, %314 : vector<24x128xf32>
    %320 = arith.mulf %319, %314 : vector<24x128xf32>
    %321 = arith.addf %314, %320 : vector<24x128xf32>
    %cst_119 = arith.constant 0.797884583 : f32
    %322 = vector.broadcast %cst_119 : f32 to vector<24x128xf32>
    %323 = arith.mulf %322, %321 : vector<24x128xf32>
    %324 = math.tanh %323 : vector<24x128xf32>
    %cst_120 = arith.constant 1.000000e+00 : f32
    %325 = vector.broadcast %cst_120 : f32 to vector<24x128xf32>
    %326 = arith.addf %325, %324 : vector<24x128xf32>
    %327 = arith.mulf %316, %326 : vector<24x128xf32>
    %328 = arith.truncf %327 : vector<24x128xf32> to vector<24x128xbf16>
    %329 = arith.index_cast %c1_i32_65 : i32 to index
    %c0_121 = arith.constant 0 : index
    %c0_122 = arith.constant 0 : index
    %330 = vector.load %arg8[%329, %c0_121, %c0_122] : memref<2x128x32xbf16, #tpu.memory_space<vmem>>, vector<1x128x32xbf16>
    %331 = vector.shape_cast %330 : vector<1x128x32xbf16> to vector<128x32xbf16>
    %cst_123 = arith.constant dense<0.000000e+00> : vector<24x32xf32>
    %332 = tpu.matmul %328, %331, %cst_123 {dimension_numbers = #tpu.dot_dimension_numbers<[1], [0], [0], [1], [0, 0, 1, 1], [], []>} : vector<24x128xbf16>, vector<128x32xbf16>, vector<24x32xf32> -> vector<24x32xf32>
    %333 = vector.broadcast %194 : vector<1x32xf32> to vector<24x32xf32>
    %334 = arith.addf %332, %333 : vector<24x32xf32>
    %335 = vector.broadcast %192 : vector<1x32xf32> to vector<24x32xf32>
    %336 = arith.mulf %335, %334 : vector<24x32xf32>
    %337 = arith.addf %285, %336 : vector<24x32xf32>
    %c2_i32 = arith.constant 2 : i32
    %338 = vector.extract_strided_slice %0 {offsets = [2, 0], sizes = [1, 32], strides = [1, 1]} : vector<4x128xf32> to vector<1x32xf32>
    %339 = vector.extract_strided_slice %0 {offsets = [3, 0], sizes = [1, 32], strides = [1, 1]} : vector<4x128xf32> to vector<1x32xf32>
    %340 = vector.extract_strided_slice %337 {offsets = [0, 0], sizes = [1, 32], strides = [1, 1]} : vector<24x32xf32> to vector<1x32xf32>
    %cst_124 = arith.constant dense<0.000000e+00> : vector<1xf32>
    %341 = vector.multi_reduction <add>, %340, %cst_124 [1] : vector<1x32xf32> to vector<1xf32>
    %342 = vector.shape_cast %341 : vector<1xf32> to vector<1x1xf32>
    %cst_125 = arith.constant 3.200000e+01 : f32
    %343 = vector.broadcast %cst_125 : f32 to vector<1x1xf32>
    %344 = arith.divf %342, %343 : vector<1x1xf32>
    %345 = vector.broadcast %344 : vector<1x1xf32> to vector<1x32xf32>
    %346 = arith.subf %340, %345 : vector<1x32xf32>
    %347 = arith.mulf %346, %346 : vector<1x32xf32>
    %cst_126 = arith.constant dense<0.000000e+00> : vector<1xf32>
    %348 = vector.multi_reduction <add>, %347, %cst_126 [1] : vector<1x32xf32> to vector<1xf32>
    %349 = vector.shape_cast %348 : vector<1xf32> to vector<1x1xf32>
    %cst_127 = arith.constant 3.200000e+01 : f32
    %350 = vector.broadcast %cst_127 : f32 to vector<1x1xf32>
    %351 = arith.divf %349, %350 : vector<1x1xf32>
    %352 = vector.broadcast %344 : vector<1x1xf32> to vector<1x32xf32>
    %353 = arith.subf %340, %352 : vector<1x32xf32>
    %cst_128 = arith.constant 9.99999997E-7 : f32
    %354 = vector.broadcast %cst_128 : f32 to vector<1x1xf32>
    %355 = arith.addf %351, %354 : vector<1x1xf32>
    %356 = math.rsqrt %355 : vector<1x1xf32>
    %357 = vector.broadcast %356 : vector<1x1xf32> to vector<1x32xf32>
    %358 = arith.mulf %353, %357 : vector<1x32xf32>
    %359 = arith.mulf %358, %338 : vector<1x32xf32>
    %360 = arith.addf %359, %339 : vector<1x32xf32>
    %361 = vector.shape_cast %360 : vector<1x32xf32> to vector<1x1x32xf32>
    %c0_129 = arith.constant 0 : index
    %c0_130 = arith.constant 0 : index
    %c0_131 = arith.constant 0 : index
    %362 = vector.load %arg10[%c0_129, %c0_130, %c0_131] : memref<1x1x32xf32, #tpu.memory_space<vmem>>, vector<1x1x32xf32>
    tpu.vector_store %arg10[%c0_129, %c0_130, %c0_131], %361 {strides = array<i32>} : memref<1x1x32xf32, #tpu.memory_space<vmem>>, vector<1x1x32xf32>,
    return
  }
  func.func @transform_0(%arg0: i32) -> (i32, i32, i32) {
    %c0_i32 = arith.constant 0 : i32
    %c0_i32_0 = arith.constant 0 : i32
    %c0_i32_1 = arith.constant 0 : i32
    return %arg0, %c0_i32, %c0_i32_0 : i32, i32, i32
  }
  func.func @transform_1(%arg0: i32) -> (i32, i32) {
    %c0_i32 = arith.constant 0 : i32
    %c0_i32_0 = arith.constant 0 : i32
    %c0_i32_1 = arith.constant 0 : i32
    return %c0_i32, %c0_i32_0 : i32, i32
  }
  func.func @transform_2(%arg0: i32) -> (i32, i32) {
    %c0_i32 = arith.constant 0 : i32
    %c0_i32_0 = arith.constant 0 : i32
    %c0_i32_1 = arith.constant 0 : i32
    return %c0_i32, %c0_i32_0 : i32, i32
  }
  func.func @transform_3(%arg0: i32) -> (i32, i32) {
    %c0_i32 = arith.constant 0 : i32
    %c0_i32_0 = arith.constant 0 : i32
    %c0_i32_1 = arith.constant 0 : i32
    return %c0_i32, %c0_i32_0 : i32, i32
  }
  func.func @transform_4(%arg0: i32) -> (i32, i32, i32) {
    %c0_i32 = arith.constant 0 : i32
    %c0_i32_0 = arith.constant 0 : i32
    %c0_i32_1 = arith.constant 0 : i32
    %c0_i32_2 = arith.constant 0 : i32
    return %c0_i32, %c0_i32_0, %c0_i32_1 : i32, i32, i32
  }
  func.func @transform_5(%arg0: i32) -> (i32, i32, i32) {
    %c0_i32 = arith.constant 0 : i32
    %c0_i32_0 = arith.constant 0 : i32
    %c0_i32_1 = arith.constant 0 : i32
    %c0_i32_2 = arith.constant 0 : i32
    return %c0_i32, %c0_i32_0, %c0_i32_1 : i32, i32, i32
  }
  func.func @transform_6(%arg0: i32) -> (i32, i32, i32) {
    %c0_i32 = arith.constant 0 : i32
    %c0_i32_0 = arith.constant 0 : i32
    %c0_i32_1 = arith.constant 0 : i32
    %c0_i32_2 = arith.constant 0 : i32
    return %c0_i32, %c0_i32_0, %c0_i32_1 : i32, i32, i32
  }
  func.func @transform_7(%arg0: i32) -> (i32, i32, i32) {
    %c0_i32 = arith.constant 0 : i32
    %c0_i32_0 = arith.constant 0 : i32
    %c0_i32_1 = arith.constant 0 : i32
    %c0_i32_2 = arith.constant 0 : i32
    return %c0_i32, %c0_i32_0, %c0_i32_1 : i32, i32, i32
  }
  func.func @transform_8(%arg0: i32) -> (i32, i32, i32) {
    %c0_i32 = arith.constant 0 : i32
    %c0_i32_0 = arith.constant 0 : i32
    %c0_i32_1 = arith.constant 0 : i32
    %c0_i32_2 = arith.constant 0 : i32
    return %c0_i32, %c0_i32_0, %c0_i32_1 : i32, i32, i32
  }
  func.func @transform_9(%arg0: i32) -> (i32, i32, i32) {
    %c0_i32 = arith.constant 0 : i32
    %c0_i32_0 = arith.constant 0 : i32
    %c0_i32_1 = arith.constant 0 : i32
    return %arg0, %c0_i32, %c0_i32_0 : i32, i32, i32
  }
}

</mosaic_0001>

<bundles_post_ra>
// kernel: dinov2_forward.1
= control target key start
LH: loop header
LB: loop body
LE: loop exit
PB: predicated region body
PF: predicated region fallthrough
CT: control target
= control target key end

     0   :  { %14 = vsyncpa [#allocation5], 0  ;;  %s3495_s0 = inlined_call_operand.vmem [shape: f32[2,24,48], index: 0, kind: input, shape index: {}]   ;;  %s3496_s1 = inlined_call_operand.vmem [shape: f32[24,32], index: 1, kind: input, shape index: {}]   ;;  %s3497_s2 = inlined_call_operand.vmem [shape: f32[4,128], index: 2, kind: input, shape index: {}]   ;;  %s3498_s3 = inlined_call_operand.vmem [shape: bf16[48,32], index: 3, kind: input, shape index: {}]   ;;  %s3499_s4 = inlined_call_operand.vmem [shape: bf16[2,32,96], index: 4, kind: input, shape index: {}]   ;;  %s3500_s5 = inlined_call_operand.vmem [shape: bf16[2,32,32], index: 5, kind: input, shape index: {}]   ;;  %s3501_s6 = inlined_call_operand.vmem [shape: bf16[2,32,128], index: 6, kind: input, shape index: {}]   ;;  %s3502_s7 = inlined_call_operand.vmem [shape: bf16[2,128,32], index: 7, kind: input, shape index: {}]   ;;  %s3503_s8 = inlined_call_operand.vmem [shape: f32[2,10,128], index: 8, kind: input, shape index: {}]   ;;  %s3504_s9 = inlined_call_operand.hbm [shape: f32[2,1,32], index: 9, kind: output, shape index: {}]  }
   0x1   :  { %16 = vsyncpa [#allocation5 + $0x1], 0  ;;  %s2950_s30 = smov 0   ;;  %s2952_s10 = smov 0  }
   0x2   :  { %s2954_s11 = smov 0   ;;  %s2956_s12 = smov 0  }
   0x3 LB: > { %s2971_s13 = sadd.s32 4294967295, %s2890_s12   ;;  %s2309_s14 = sadd.s32 4294967294, %s2890_s12   ;;  %s2890_s12 = sphi %s2956_s12, %s3516_s12   ;;  %s2886_s11 = sphi %s2954_s11, %s3515_s11   ;;  %s2882_s10 = sphi %s2952_s10, %s3514_s10   ;;  %s2878_s30 = sphi %s2950_s30, %s3513_s30  }
   0x4   : > { %s2975_s15 = sadd.s32 1, %s2890_s12   ;;  %s223_s16 = sadd.s32 1, %s2886_s11 }
   0x5   : > { %s220_s17 = ssub.s32 %s2890_s12, %s2975_s15  ;;  %p233_p0 = scmp.ne.s32.totalorder %s2886_s11, %s2882_s10 }
   0x6   : > { %p221_p1 = scmp.eq.s32.totalorder %s220_s17, 0  ;;  %p234_p2 = scmp.eq.s32.totalorder %s2971_s13, 1 }
   0x7   : > { %p239_p3 = scmp.ne.s32.totalorder %s2882_s10, %s2878_s30  ;;  %p240_p4 = scmp.eq.s32.totalorder %s2309_s14, 1 }
   0x8   : > { %s2986_s18 = scalar_select %p221_p1, %s2886_s11, %s223_s16  }
   0x9   : > { %p2988_p5 = por %p234_p2, %p233_p0  ;;  %p2992_p6 = por %p240_p4, %p239_p3 }
   0xa   : > { %p2312_p7 = scmp.ge.s32.totalorder %s2890_s12, 1  ;;  %p290_p8 = scmp.lt.s32.totalorder %s2890_s12, 3 }
   0xc   : > { %p291_p9 = pnand %p2312_p7, %p290_p8 }
   0xd   : > { %v2710_v0 = vld [vmem:[%s3498_s3] sm:$0xff] (!%p291_p9)   ;;  %p325_p10 = scmp.lt.s32.totalorder (!%p291_p9), %s2971_s13, 1  ;;  %v332_v1 = vlaneseq (!%p291_p9)  ;;  %v2711_v2 = vld [vmem:[%s3498_s3 + $0x8] sm:$0xff] (!%p291_p9)   ;;  %v2712_v5 = vld [vmem:[%s3498_s3 + $0x10] sm:$0xff] (!%p291_p9)   ;;  %vm400_vm0 = vcmask (!%p291_p9), 392192   ;;  %vm461_vm3 = vcmask (!%p291_p9), 261120  }
   0xe   : > { %294 = sbr.rel (%p291_p9) target bundleno = 6321 (0x18b1), region = 56  ;;  %2489 = vmatprep.subr.bf16.mxu1 (!%p291_p9), %v2710_v0  ;;  %v331_v3 = vld [vmem:[%s3497_s2] sm:$0xf] (!%p291_p9)  ;;  %v381_v24 = vld [vmem:[%s3496_s1 + $0x10] sm:$0xff] (!%p291_p9)  ;;  %v380_v29 = vld [vmem:[%s3496_s1 + $0x8] sm:$0xff] (!%p291_p9)  ;;  %vm592_vm4 = vcmask (!%p291_p9), 785408  }
   0xf   : > { %2490 = vmatpush3.bf16.msra.mxu1 (!%p291_p9), %v2710_v0  ;;  %v3010_v4 = vshrl.u32 (!%p291_p9), %v332_v1, 7  ;;  %v379_v25 = vld [vmem:[%s3496_s1] sm:$0xff] (!%p291_p9)  ;;  %v2714_v53 = vld [vmem:[%s3499_s4 + $0x8] sm:$0xff] (!%p291_p9)   ;;  %s2892_s24 = smov (!%p291_p9), 96   ;;  %vm607_vm5 = vcmask (!%p291_p9), 130048   ;;  %vm674_vm7 = vcmask (!%p291_p9), 195584  }
  0x10   : > { %2491 = vmatprep.subr.bf16.mxu1 (!%p291_p9), %v2711_v2  ;;  %v2713_v52 = vld [vmem:[%s3499_s4] sm:$0xff] (!%p291_p9)   ;;  %s2895_s26 = smov (!%p291_p9), 112   ;;  %s2896_s27 = smov (!%p291_p9), 80   ;;  %vm721_vm8 = vcmask (!%p291_p9), 1043456   ;;  %vm966_vm9 = vcmask (!%p291_p9), 261248   ;;  %vm2219_vm10 = vcmask (!%p291_p9), 253952  }
  0x11   : > { %v3016_v6 = vsub.s32 (!%p291_p9), 0, %v3010_v4  ;;  %v3019_v7 = vsub.s32 (!%p291_p9), 1, %v3010_v4  ;;  %v335_v8 = vadd.s32 (!%p291_p9), 16, %v3010_v4  ;;  %vm336_vm1 = vcmp.ge.s32.totalorder (!%p291_p9), %v3010_v4, 1  ;;  %v3066_v63 = vld [vmem:[%s3503_s8] sm:$0xff] (!%p291_p9)  ;;  %s3507_s28 = smov (!%p291_p9), 48  }
  0x12   : > { %s3512_s17 = smov (!%p291_p9), 16  }
  0x13   : > { %2492 = vmatpush3.bf16.msra.mxu1 (!%p291_p9), %v2711_v2  ;;  %v351_v12 = vrot.slane (!%p291_p9), %v331_v3, %v3016_v6  ;;  %v358_v13 = vrot.slane (!%p291_p9), %v331_v3, %v3019_v7  ;;  %vm341_vm2 = vcmp.lt.s32.totalorder (!%p291_p9), %v335_v8, 17  ;;  %v505_v3 = vrot.slane (!%p291_p9), %v3066_v63, %v3016_v6 }
  0x14   : > { %2493 = vmatprep.subr.bf16.mxu1 (!%p291_p9), %v2712_v5 }
  0x15   : > { %s326_s25 = scalar_select %p325_p10, %s2971_s13, 1 }
  0x17   : > { %s2663_s14 = smul.u32 24, %s326_s25  ;;  %2494 = vmatpush3.bf16.msra.mxu1 %v2712_v5  ;;  %s2894_s25 = smov 64  }
  0x18   : > { %2499 = vmatprep.subr.bf16.mxu1 %v2713_v52 }
  0x19   : > { %s329_s21 = scalar_lea.vmem %s3495_s0, %s2663_s14 }
  0x1a   : > { %v345_v9 = vld [vmem:[%s329_s21] sm:$0xff]  ;;  %v346_v10 = vld [vmem:[%s329_s21 + $0x8] sm:$0xff]  ;;  %v347_v11 = vld [vmem:[%s329_s21 + $0x10] sm:$0xff]  ;;  %s3505_s21 = smov 16  }
  0x1b   : > { %v352_v14 = vmul.f32 %v351_v12, %v345_v9  ;;  %v353_v15 = vmul.f32 %v351_v12, %v346_v10  ;;  %v354_v16 = vmul.f32 %v351_v12, %v347_v11  ;;  %v512_v12 = vrot.slane %v3066_v63, %v3019_v7 }
  0x1d   : > { %v359_v17 = vsub.f32 %v352_v14, %v358_v13  ;;  %v360_v18 = vsub.f32 %v353_v15, %v358_v13  ;;  %v361_v19 = vsub.f32 %v354_v16, %v358_v13 }
  0x1f   : > { %v368_v20 = vsel %vm336_vm1, %v359_v17, 0.0  ;;  %v370_v21 = vsel %vm341_vm2, %v361_v19, 0.0 }
  0x20   : > { %v371_v22 = vpack.c.bf16 %v360_v18, %v368_v20  ;;  %v372_v23 = vpack.c.bf16 %v370_v21, %v370_v21  ;;  %v3077_v20 = vld [vmem:[%s3503_s8 + $0x8] sm:$0x3] }
  0x21   : > { %v525_v21 = vrot.slane %v3077_v20, %v3019_v7 }
  0x22   : > { %2495 = vmatprep.mubr.msk.bf16.mxu1 %vm400_vm0, %v371_v22 }
  0x23   : > { %2496 = vmatmul.mubr.msk.bf16.vlgmr.msra.gmra.mrb[0].mxu1 %vm400_vm0, %v372_v23 }
  0x24   : > { %2500 = vmatpush3.bf16.msra.mxu1 %v2713_v52 }
  0x25   : > { %2501 = vmatprep.subr.bf16.mxu1 %v2714_v53 }
  0x28   : > { %2502 = vmatpush3.bf16.msra.mxu1 %v2714_v53 }
  0xf6   : > { %v2497_v26 = vpop.f32.mrb[0].mxu1 }
  0xf7   : > { %v3036_v27 = vadd.f32 %v2497_v26, %v381_v24  ;;  %v441_v28 = vpop.f32.mrb[1].mxu1 }
  0xf8   : > { %v3041_v30 = vadd.f32 %v441_v28, %v379_v25  ;;  %v2498_v31 = vpop.f32.mrb[2].mxu1 }
  0xf9   : > { %v444_v32 = vpop.f32.mrb[3].mxu1  ;;  %v468_v33 = vsel %vm461_vm3, %v3036_v27, 0.0 }
  0xfa   : > { %v3045_v34 = vadd.f32 %v444_v32, %v380_v29  ;;  %469 = vadd.xlane.f32.xlu1 %v468_v33  ;;  %v462_v35 = vsel %vm461_vm3, %v3041_v30, 0.0 }
  0xfb   : > { %463 = vadd.xlane.f32.xlu0 %v462_v35 }
  0xfc   : > { %v465_v36 = vsel %vm461_vm3, %v3045_v34, 0.0 }
  0xff   : > { %466 = vadd.xlane.f32.xlu0 %v465_v36 }
 0x187   : > { %v470_v37 = vpop.xlane.xlu1 %469 }
 0x188   : > { %v474_v38 = vmul.f32 0.03125, %v470_v37  ;;  %v464_v39 = vpop.xlane.xlu0 %463 }
 0x189   : > { %v472_v40 = vmul.f32 0.03125, %v464_v39 }
 0x18a   : > { %v477_v41 = vsub.f32 %v3036_v27, %v474_v38 }
 0x18b   : > { %v475_v42 = vsub.f32 %v3041_v30, %v472_v40 }
 0x18c   : > { %v467_v43 = vpop.xlane.xlu0 %466  ;;  %v480_v48 = vmul.f32 %v477_v41, %v477_v41 }
 0x18d   : > { %v473_v44 = vmul.f32 0.03125, %v467_v43  ;;  %v478_v45 = vmul.f32 %v475_v42, %v475_v42 }
 0x18e   : > { %v487_v50 = vsel %vm461_vm3, %v480_v48, 0.0 }
 0x18f   : > { %v476_v46 = vsub.f32 %v3045_v34, %v473_v44  ;;  %v481_v47 = vsel %vm461_vm3, %v478_v45, 0.0  ;;  %v2893_v44 = vmov -1e+30  }
 0x190   : > { %482 = vadd.xlane.f32.xlu1 %v481_v47 }
 0x191   : > { %v479_v49 = vmul.f32 %v476_v46, %v476_v46 }
 0x193   : > { %v484_v51 = vsel %vm461_vm3, %v479_v49, 0.0 }
 0x194   : > { %488 = vadd.xlane.f32.xlu1 %v487_v50  ;;  %485 = vadd.xlane.f32.xlu0 %v484_v51 }
 0x21d   : > { %v483_v54 = vpop.xlane.xlu1 %482 }
 0x21e   : > { %v490_v55 = vmul.f32 0.03125, %v483_v54 }
 0x220   : > { %v493_v56 = vadd.f32 1e-06, %v490_v55 }
 0x221   : > { %v489_v57 = vpop.xlane.xlu1 %488  ;;  %v486_v58 = vpop.xlane.xlu0 %485 }
 0x222   : > { %2741 = vrsqrt.f32 %v493_v56  ;;  %v492_v59 = vmul.f32 0.03125, %v489_v57  ;;  %v491_v60 = vmul.f32 0.03125, %v486_v58 }
 0x224   : > { %v495_v61 = vadd.f32 1e-06, %v492_v59  ;;  %v494_v62 = vadd.f32 1e-06, %v491_v60 }
 0x226   : > { %2743 = vrsqrt.f32 %v495_v61 }
 0x227   : > { %2745 = vrsqrt.f32 %v494_v62 }
 0x22c   : > { %v2742_v0 = vpop.eup %2741 }
 0x22d   : > { %v499_v2 = vmul.f32 %v2742_v0, %v475_v42 }
 0x22f   : > { %v506_v11 = vmul.f32 %v505_v3, %v499_v2 }
 0x230   : > { %v2744_v5 = vpop.eup %2743 }
 0x231   : > { %v2746_v8 = vpop.eup %2745  ;;  %v501_v9 = vmul.f32 %v2744_v5, %v477_v41  ;;  %v513_v16 = vadd.f32 %v512_v12, %v506_v11  ;;  %v456_v41 = vand.u32 127, %v332_v1 }
 0x232   : > { %v500_v10 = vmul.f32 %v2746_v8, %v476_v46 }
 0x233   : > { %v508_v13 = vmul.f32 %v505_v3, %v501_v9  ;;  %vm457_vm6 = vcmp.lt.s32.totalorder %v456_v41, 17 }
 0x234   : > { %v507_v14 = vmul.f32 %v505_v3, %v500_v10  ;;  %v3101_v45 = vsel %vm457_vm6, 0.0, %v2893_v44 }
 0x235   : > { %v515_v15 = vadd.f32 %v512_v12, %v508_v13 }
 0x236   : > { %v514_v17 = vadd.f32 %v512_v12, %v507_v14 }
 0x237   : > { %v517_v18 = vpack.c.bf16 %v515_v15, %v515_v15 }
 0x238   : > { %v516_v19 = vpack.c.bf16 %v514_v17, %v513_v16 }
 0x23a   : > { %2503 = vmatprep.mubr.msk.bf16.mxu1 %vm461_vm3, %v516_v19 }
 0x23b   : > { %2504 = vmatmul.mubr.msk.bf16.vlgmr.msra.gmra.mrb[4].mxu1 %vm461_vm3, %v517_v18 }
 0x30e   : > { %v2505_v22 = vpop.f32.mrb[4].mxu1 }
 0x30f   : > { %v587_v23 = vadd.f32 %v2505_v22, %v525_v21  ;;  %v578_v24 = vpop.f32.mrb[5].mxu1 }
 0x310   : > { %v579_v25 = vadd.f32 %v578_v24, %v525_v21  ;;  %v2506_v26 = vpop.f32.mrb[6].mxu1 }
 0x311   : > { %595 = vst.msk [vmem:[#allocation2 + $0x10] sm:$0xff] %vm592_vm4, %v587_v23  ;;  %v581_v28 = vpop.f32.mrb[7].mxu1 }
 0x312   : > { %593 = vst.msk [vmem:[#allocation2] sm:$0xff] %vm592_vm4, %v579_v25  ;;  %v582_v29 = vadd.f32 %v581_v28, %v525_v21 }
 0x314   : > { %594 = vst.msk [vmem:[#allocation2 + $0x8] sm:$0xff] %vm592_vm4, %v582_v29 }
 0x318   : > { %v598_v31 = vld [vmem:[#allocation2 + $0x10] sm:$0xff] }
 0x319   : > { %v3084_v32 = vpack.c.bf16 %v598_v31, %v598_v31  ;;  %v596_v33 = vld [vmem:[#allocation2] sm:$0xff] }
 0x31b   : > { %605 = vrot.lane.b32.xlu1 %v3084_v32, %s2892_s24  ;;  %v597_v35 = vld [vmem:[#allocation2 + $0x8] sm:$0xff] }
 0x31c   : > { %v3088_v36 = vpack.c.bf16 %v597_v35, %v596_v33 }
 0x31e   : > { %603 = vrot.lane.b32.xlu0 %v3088_v36, %s2892_s24  ;;  %2511 = vmatprep.mubr.msk.bf16.mxu1 %vm607_vm5, %v3088_v36 }
 0x38d   : > { %v606_v39 = vpop.permute.xlu1 %605 }
 0x38e   : > { %v618_v40 = vsel %vm607_vm5, %v606_v39, 0 }
 0x390   : > { %v604_v37 = vpop.permute.xlu0 %603 }
 0x391   : > { %v615_v38 = vsel %vm607_vm5, %v604_v37, 0  ;;  %2651 = vmatprep.subr.msk.bf16.mxu1 %vm607_vm5, %v604_v37 }
 0x392   : > { %2508 = vmatpush3.bf16.xpose.msra.mxu1 %v615_v38 }
 0x393   : > { %2652 = vmatprep.subr.msk.bf16.mxu1 %vm607_vm5, %v606_v39 }
 0x39a   : > { %2510 = vmatpush3.bf16.xpose.msra.mxu1 %v618_v40 }
 0x3a1   : > { %2512 = vmatmul.mubr.msk.bf16.vlgmr.msra.gmra.mrb[8].mxu1 %vm607_vm5, %v3084_v32 }
 0x474   : > { %v2513_v42 = vpop.f32.mrb[8].mxu1 }
 0x475   : > { %v654_v43 = vpop.f32.mrb[9].mxu1  ;;  %v670_v49 = vmul.f32 0.25, %v2513_v42 }
 0x476   : > { %v668_v46 = vmul.f32 0.25, %v654_v43  ;;  %v2514_v47 = vpop.f32.mrb[10].mxu1 }
 0x477   : > { %v657_v48 = vpop.f32.mrb[11].mxu1  ;;  %v673_v54 = vadd.f32 %v670_v49, %v3101_v45 }
 0x478   : > { %v669_v50 = vmul.f32 0.25, %v657_v48  ;;  %v671_v51 = vadd.f32 %v668_v46, %v3101_v45 }
 0x479   : > { %v681_v55 = vsel %vm674_vm7, %v673_v54, -inf }
 0x47a   : > { %v675_v52 = vsel %vm674_vm7, %v671_v51, -inf  ;;  %v672_v53 = vadd.f32 %v669_v50, %v3101_v45 }
 0x47b   : > { %676 = vmax.xlane.f32.xlu1 %v675_v52 }
 0x47c   : > { %v678_v1 = vsel %vm674_vm7, %v672_v53, -inf }
 0x47d   : > { %679 = vmax.xlane.f32.xlu0 %v678_v1 }
 0x481   : > { %682 = vmax.xlane.f32.xlu0 %v681_v55 }
 0x508   : > { %v677_v56 = vpop.xlane.xlu1 %676 }
 0x509   : > { %v684_v59 = vsub.f32 %v671_v51, %v677_v56 }
 0x50a   : > { %v680_v57 = vpop.xlane.xlu0 %679 }
 0x50b   : > { %v685_v58 = vsub.f32 %v672_v53, %v680_v57  ;;  %v687_v0 = vmul.f32 1.442695, %v684_v59 }
 0x50d   : > { %v689_v60 = vmul.f32 1.442695, %v685_v58 }
 0x50e   : > { %v683_v61 = vpop.xlane.xlu0 %682 }
 0x50f   : > { %2747 = vpow2.f32 %v689_v60  ;;  %v686_v62 = vsub.f32 %v673_v54, %v683_v61 }
 0x511   : > { %v691_v2 = vmul.f32 1.442695, %v686_v62 }
 0x513   : > { %2749 = vpow2.f32 %v691_v2 }
 0x514   : > { %2751 = vpow2.f32 %v687_v0 }
 0x519   : > { %v2748_v3 = vpop.eup %2747 }
 0x51a   : > { %v696_v5 = vsel %vm674_vm7, %v2748_v3, 0.0 }
 0x51b   : > { %697 = vadd.xlane.f32.xlu0 %v696_v5 }
 0x51d   : > { %v2750_v8 = vpop.eup %2749 }
 0x51e   : > { %v699_v9 = vsel %vm674_vm7, %v2750_v8, 0.0  ;;  %v2752_v10 = vpop.eup %2751 }
 0x51f   : > { %700 = vadd.xlane.f32.xlu1 %v699_v9  ;;  %v693_v11 = vsel %vm674_vm7, %v2752_v10, 0.0 }
 0x523   : > { %694 = vadd.xlane.f32.xlu1 %v693_v11 }
 0x531   : > { %710 = vrot.lane.b32.xlu0 %v3088_v36, %s2894_s25 }
 0x534   : > { %712 = vrot.lane.b32.xlu1 %v3084_v32, %s2894_s25 }
 0x535   : > { %783 = vrot.lane.b32.xlu0 %v3088_v36, %s2895_s26 }
 0x538   : > { %787 = vrot.lane.b32.xlu1 %v3088_v36, %s2896_s27 }
 0x53c   : > { %789 = vrot.lane.b32.xlu1 %v3084_v32, %s2896_s27 }
 0x540   : > { %785 = vrot.lane.b32.xlu1 %v3084_v32, %s2895_s26 }
 0x5a8   : > { %v698_v12 = vpop.xlane.xlu0 %697 }
 0x5ac   : > { %v701_v13 = vpop.xlane.xlu1 %700  ;;  %v711_v14 = vpop.permute.xlu0 %710 }
 0x5ad   : > { %2515 = vmatprep.subr.bf16.mxu0 %v711_v14  ;;  %2753 = vrcp.f32 %v701_v13 }
 0x5ae   : > { %2516 = vmatpush3.bf16.msra.mxu0 %v711_v14  ;;  %2755 = vrcp.f32 %v698_v12 }
 0x5b0   : > { %v695_v15 = vpop.xlane.xlu1 %694  ;;  %v784_v29 = vpop.permute.xlu0 %783 }
 0x5b1   : > { %2757 = vrcp.f32 %v695_v15 }
 0x5b4   : > { %v713_v16 = vpop.permute.xlu1 %712 }
 0x5b5   : > { %2653 = vmatprep.subr.msk.bf16.mxu0 %vm721_vm8, %v713_v16  ;;  %v723_v17 = vsel %vm721_vm8, %v713_v16, 0 }
 0x5b6   : > { %2518 = vmatpush3.bf16.msra.mxu0 %v723_v17 }
 0x5b7   : > { %v2754_v18 = vpop.eup %2753 }
 0x5b8   : > { %v788_v19 = vpop.permute.xlu1 %787  ;;  %v2756_v21 = vpop.eup %2755  ;;  %v707_v23 = vmul.f32 %v2754_v18, %v2750_v8 }
 0x5b9   : > { %2654 = vmatprep.subr.msk.bf16.mxu0 %vm607_vm5, %v788_v19  ;;  %v706_v25 = vmul.f32 %v2756_v21, %v2748_v3  ;;  %v798_v31 = vsel %vm607_vm5, %v788_v19, 0 }
 0x5ba   : > { %v709_v28 = vpack.c.bf16 %v707_v23, %v707_v23 }
 0x5bb   : > { %v2758_v22 = vpop.eup %2757 }
 0x5bc   : > { %v705_v24 = vmul.f32 %v2758_v22, %v2752_v10  ;;  %v790_v33 = vpop.permute.xlu1 %789 }
 0x5bd   : > { %v801_v35 = vsel %vm607_vm5, %v790_v33, 0 }
 0x5be   : > { %v708_v26 = vpack.c.bf16 %v706_v25, %v705_v24  ;;  %v2715_v24 = vld [vmem:[%s3500_s5] sm:$0xff]   ;;  %v2716_v25 = vld [vmem:[%s3500_s5 + $0x8] sm:$0xff]  }
 0x5c0   : > { %2519 = vmatprep.mubr.msk.bf16.mxu0 %vm674_vm7, %v708_v26  ;;  %v786_v37 = vpop.permute.xlu1 %785 }
 0x5c1   : > { %2520 = vmatmul.mubr.msk.bf16.vlgmr.msra.gmra.mrb[0].mxu0 %vm674_vm7, %v709_v28 }
 0x5c2   : > { %2524 = vmatpush3.bf16.xpose.msra.mxu0 %v798_v31  ;;  %2527 = vmatprep.mubr.msk.bf16.mxu0 %vm607_vm5, %v784_v29 }
 0x5c3   : > { %2655 = vmatprep.subr.msk.bf16.mxu0 %vm607_vm5, %v790_v33 }
 0x5ca   : > { %2526 = vmatpush3.bf16.xpose.msra.mxu0 %v801_v35 }
 0x5d1   : > { %2528 = vmatmul.mubr.msk.bf16.vlgmr.msra.gmra.mrb[4].mxu0 %vm607_vm5, %v786_v37 }
 0x694   : > { %v2521_v38 = vpop.f32.mrb[0].mxu0 }
 0x695   : > { %775 = vst.msk [vmem:[#allocation3 + $0x10] sm:$0xff] %vm607_vm5, %v2521_v38  ;;  %v759_v39 = vpop.f32.mrb[1].mxu0 }
 0x696   : > { %773 = vst.msk [vmem:[#allocation3] sm:$0xff] %vm607_vm5, %v759_v39  ;;  %v2522_v40 = vpop.f32.mrb[2].mxu0 }
 0x697   : > { %v762_v41 = vpop.f32.mrb[3].mxu0 }
 0x698   : > { %774 = vst.msk [vmem:[#allocation3 + $0x8] sm:$0xff] %vm607_vm5, %v762_v41 }
 0x6a4   : > { %v2529_v42 = vpop.f32.mrb[4].mxu0 }
 0x6a5   : > { %v837_v43 = vpop.f32.mrb[5].mxu0  ;;  %v853_v44 = vmul.f32 0.25, %v2529_v42 }
 0x6a6   : > { %v851_v46 = vmul.f32 0.25, %v837_v43  ;;  %v2530_v47 = vpop.f32.mrb[6].mxu0  ;;  %v981_v43 = vsub.s32 6, %v3010_v4 }
 0x6a7   : > { %v840_v48 = vpop.f32.mrb[7].mxu0  ;;  %v856_v53 = vadd.f32 %v853_v44, %v3101_v45  ;;  %v1051_v44 = vsub.s32 4, %v3010_v4 }
 0x6a8   : > { %v852_v49 = vmul.f32 0.25, %v840_v48  ;;  %v854_v50 = vadd.f32 %v851_v46, %v3101_v45  ;;  %v982_v46 = vrot.slane %v3066_v63, %v981_v43 }
 0x6a9   : > { %v863_v54 = vsel %vm674_vm7, %v856_v53, -inf  ;;  %v1052_v48 = vrot.slane %v3066_v63, %v1051_v44 }
 0x6aa   : > { %v857_v51 = vsel %vm674_vm7, %v854_v50, -inf  ;;  %v855_v52 = vadd.f32 %v852_v49, %v3101_v45 }
 0x6ab   : > { %858 = vmax.xlane.f32.xlu0 %v857_v51 }
 0x6ac   : > { %v860_v1 = vsel %vm674_vm7, %v855_v52, -inf }
 0x6ad   : > { %861 = vmax.xlane.f32.xlu1 %v860_v1 }
 0x6af   : > { %864 = vmax.xlane.f32.xlu0 %v863_v54 }
 0x738   : > { %v859_v55 = vpop.xlane.xlu0 %858 }
 0x739   : > { %v866_v56 = vsub.f32 %v854_v50, %v859_v55 }
 0x73a   : > { %v862_v57 = vpop.xlane.xlu1 %861 }
 0x73b   : > { %v869_v58 = vmul.f32 1.442695, %v866_v56  ;;  %v867_v59 = vsub.f32 %v855_v52, %v862_v57 }
 0x73c   : > { %v865_v60 = vpop.xlane.xlu0 %864 }
 0x73d   : > { %2759 = vpow2.f32 %v869_v58  ;;  %v871_v61 = vmul.f32 1.442695, %v867_v59  ;;  %v868_v62 = vsub.f32 %v856_v53, %v865_v60 }
 0x73f   : > { %2761 = vpow2.f32 %v871_v61  ;;  %v873_v0 = vmul.f32 1.442695, %v868_v62 }
 0x741   : > { %2763 = vpow2.f32 %v873_v0 }
 0x747   : > { %v2760_v2 = vpop.eup %2759 }
 0x748   : > { %v875_v3 = vsel %vm674_vm7, %v2760_v2, 0.0 }
 0x749   : > { %v2762_v5 = vpop.eup %2761  ;;  %876 = vadd.xlane.f32.xlu0 %v875_v3 }
 0x74a   : > { %v878_v10 = vsel %vm674_vm7, %v2762_v5, 0.0 }
 0x74b   : > { %v2764_v8 = vpop.eup %2763 }
 0x74c   : > { %v881_v9 = vsel %vm674_vm7, %v2764_v8, 0.0 }
 0x74d   : > { %882 = vadd.xlane.f32.xlu1 %v881_v9  ;;  %879 = vadd.xlane.f32.xlu0 %v878_v10 }
 0x75e   : > { %894 = vrot.lane.b32.xlu1 %v3084_v32, %s3507_s28 }
 0x763   : > { %892 = vrot.lane.b32.xlu0 %v3088_v36, %s3507_s28 }
 0x7d6   : > { %v877_v11 = vpop.xlane.xlu0 %876 }
 0x7d7   : > { %2765 = vrcp.f32 %v877_v11 }
 0x7da   : > { %v880_v12 = vpop.xlane.xlu0 %879  ;;  %v883_v13 = vpop.xlane.xlu1 %882 }
 0x7db   : > { %2767 = vrcp.f32 %v880_v12 }
 0x7dc   : > { %2769 = vrcp.f32 %v883_v13 }
 0x7de   : > { %v893_v14 = vpop.permute.xlu0 %892  ;;  %v895_v15 = vpop.permute.xlu1 %894 }
 0x7df   : > { %2531 = vmatprep.subr.bf16.mxu1 %v893_v14  ;;  %v904_v17 = vsel %vm721_vm8, %v895_v15, 0 }
 0x7e0   : > { %2532 = vmatpush3.bf16.msra.mxu1 %v893_v14 }
 0x7e1   : > { %2656 = vmatprep.subr.msk.bf16.mxu1 %vm721_vm8, %v895_v15  ;;  %v2766_v16 = vpop.eup %2765 }
 0x7e2   : > { %v887_v19 = vmul.f32 %v2766_v16, %v2760_v2  ;;  %v2717_v16 = vld [vmem:[%s3501_s6] sm:$0xff]  }
 0x7e3   : > { %2547 = vmatprep.subr.bf16.mxu0 %v2717_v16 }
 0x7e4   : > { %2534 = vmatpush3.bf16.msra.mxu1 %v904_v17  ;;  %v2718_v17 = vld [vmem:[%s3501_s6 + $0x8] sm:$0xff]   ;;  %2548 = vmatpush3.bf16.msra.mxu0 %v2717_v16 }
 0x7e5   : > { %v2768_v32 = vpop.eup %2767  ;;  %2539 = vmatprep.subr.bf16.mxu1 %v2715_v24  ;;  %2549 = vmatprep.subr.bf16.mxu0 %v2718_v17 }
 0x7e6   : > { %v2770_v18 = vpop.eup %2769  ;;  %v888_v36 = vmul.f32 %v2768_v32, %v2762_v5 }
 0x7e7   : > { %v889_v21 = vmul.f32 %v2770_v18, %v2764_v8 }
 0x7e8   : > { %v890_v22 = vpack.c.bf16 %v888_v36, %v887_v19  ;;  %2550 = vmatpush3.bf16.msra.mxu0 %v2718_v17 }
 0x7e9   : > { %v891_v23 = vpack.c.bf16 %v889_v21, %v889_v21 }
 0x7ea   : > { %2535 = vmatprep.mubr.msk.bf16.mxu1 %vm674_vm7, %v890_v22 }
 0x7eb   : > { %2536 = vmatmul.mubr.msk.bf16.vlgmr.msra.gmra.mrb[12].mxu1 %vm674_vm7, %v891_v23 }
 0x7ec   : > { %2540 = vmatpush3.bf16.msra.mxu1 %v2715_v24 }
 0x7ed   : > { %2541 = vmatprep.subr.bf16.mxu1 %v2716_v25 }
 0x7f0   : > { %2542 = vmatpush3.bf16.msra.mxu1 %v2716_v25 }
 0x8be   : > { %v2537_v26 = vpop.f32.mrb[12].mxu1 }
 0x8bf   : > { %961 = vrot.lane.b32.xlu0 %v2537_v26, %s3505_s21  ;;  %v940_v28 = vpop.f32.mrb[13].mxu1  ;;  %v1100_v26 = vsub.s32 2, %v3010_v4 }
 0x8c0   : > { %957 = vrot.lane.b32.xlu1 %v940_v28, %s3505_s21  ;;  %v2538_v29 = vpop.f32.mrb[14].mxu1 }
 0x8c1   : > { %v943_v31 = vpop.f32.mrb[15].mxu1  ;;  %v1101_v28 = vrot.slane %v3066_v63, %v1100_v26  ;;  %v1107_v29 = vsub.s32 3, %v3010_v4 }
 0x8c4   : > { %959 = vrot.lane.b32.xlu1 %v943_v31, %s3505_s21 }
 0x931   : > { %v962_v33 = vpop.permute.xlu0 %961 }
 0x932   : > { %969 = vst.msk [vmem:[#allocation3 + $0x10] sm:$0xff] %vm966_vm9, %v962_v33  ;;  %v958_v35 = vpop.permute.xlu1 %957 }
 0x933   : > { %967 = vst.msk [vmem:[#allocation3] sm:$0xff] %vm966_vm9, %v958_v35 }
 0x936   : > { %v960_v37 = vpop.permute.xlu1 %959 }
 0x937   : > { %968 = vst.msk [vmem:[#allocation3 + $0x8] sm:$0xff] %vm966_vm9, %v960_v37 }
 0x939   : > { %v972_v38 = vld [vmem:[#allocation3 + $0x10] sm:$0xff] }
 0x93a   : > { %v970_v39 = vld [vmem:[#allocation3] sm:$0xff]  ;;  %v974_v42 = vpack.c.bf16 %v972_v38, %v972_v38 }
 0x93e   : > { %v971_v40 = vld [vmem:[#allocation3 + $0x8] sm:$0xff] }
 0x93f   : > { %v973_v41 = vpack.c.bf16 %v971_v40, %v970_v39  ;;  %v1108_v39 = vrot.slane %v3066_v63, %v1107_v29 }
 0x941   : > { %2543 = vmatprep.mubr.msk.bf16.mxu1 %vm461_vm3, %v973_v41 }
 0x942   : > { %2544 = vmatmul.mubr.msk.bf16.vlgmr.msra.gmra.mrb[16].mxu1 %vm461_vm3, %v974_v42 }
 0xa15   : > { %v2545_v47 = vpop.f32.mrb[16].mxu1 }
 0xa16   : > { %v1035_v49 = vpop.f32.mrb[17].mxu1  ;;  %v1044_v50 = vadd.f32 %v2545_v47, %v982_v46 }
 0xa17   : > { %v1036_v51 = vadd.f32 %v1035_v49, %v982_v46  ;;  %v2546_v52 = vpop.f32.mrb[18].mxu1 }
 0xa18   : > { %v1038_v53 = vpop.f32.mrb[19].mxu1  ;;  %v1055_v55 = vmul.f32 %v1052_v48, %v1044_v50  ;;  %v2719_v52 = vld [vmem:[%s3502_s7] sm:$0xff]  }
 0xa19   : > { %v1053_v1 = vmul.f32 %v1052_v48, %v1036_v51  ;;  %v1039_v54 = vadd.f32 %v1038_v53, %v982_v46  ;;  %2555 = vmatprep.subr.bf16.mxu1 %v2719_v52  ;;  %v2720_v53 = vld [vmem:[%s3502_s7 + $0x8] sm:$0xff]  }
 0xa1a   : > { %v3185_v60 = vadd.f32 %v1055_v55, %v3036_v27  ;;  %2556 = vmatpush3.bf16.msra.mxu1 %v2719_v52  ;;  %v2723_v55 = vld [vmem:[%s3502_s7 + $0x20] sm:$0xff]  }
 0xa1b   : > { %v3177_v56 = vadd.f32 %v1053_v1, %v3041_v30  ;;  %v1054_v57 = vmul.f32 %v1052_v48, %v1039_v54  ;;  %2557 = vmatprep.subr.bf16.mxu1 %v2720_v53  ;;  %v2721_v1 = vld [vmem:[%s3502_s7 + $0x10] sm:$0xff]   ;;  %v2722_v54 = vld [vmem:[%s3502_s7 + $0x18] sm:$0xff]  }
 0xa1c   : > { %v1065_v62 = vsel %vm461_vm3, %v3185_v60, 0.0 }
 0xa1d   : > { %v3180_v58 = vadd.f32 %v1054_v57, %v3045_v34  ;;  %v1059_v59 = vsel %vm461_vm3, %v3177_v56, 0.0  ;;  %v2724_v57 = vld [vmem:[%s3502_s7 + $0x28] sm:$0xff]  }
 0xa1e   : > { %1060 = vadd.xlane.f32.xlu1 %v1059_v59  ;;  %2558 = vmatpush3.bf16.msra.mxu1 %v2720_v53  ;;  %v2725_v59 = vld [vmem:[%s3502_s7 + $0x30] sm:$0xff]  }
 0xa1f   : > { %v1062_v61 = vsel %vm461_vm3, %v3180_v58, 0.0  ;;  %2559 = vmatprep.subr.bf16.mxu1 %v2721_v1 }
 0xa20   : > { %1063 = vadd.xlane.f32.xlu0 %v1062_v61  ;;  %v2726_v61 = vld [vmem:[%s3502_s7 + $0x38] sm:$0xff]  }
 0xa22   : > { %2560 = vmatpush3.bf16.msra.mxu1 %v2721_v1 }
 0xa23   : > { %2561 = vmatprep.subr.bf16.mxu1 %v2722_v54 }
 0xa24   : > { %1066 = vadd.xlane.f32.xlu0 %v1065_v62  ;;  %v1121_v62 = vrot.slane %v3077_v20, %v3016_v6 }
 0xa26   : > { %2562 = vmatpush3.bf16.msra.mxu1 %v2722_v54 }
 0xa27   : > { %2563 = vmatprep.subr.bf16.mxu1 %v2723_v55 }
 0xa2a   : > { %2564 = vmatpush3.bf16.msra.mxu1 %v2723_v55 }
 0xa2b   : > { %2565 = vmatprep.subr.bf16.mxu1 %v2724_v57 }
 0xa2e   : > { %2566 = vmatpush3.bf16.msra.mxu1 %v2724_v57 }
 0xa2f   : > { %2567 = vmatprep.subr.bf16.mxu1 %v2725_v59 }
 0xa32   : > { %2568 = vmatpush3.bf16.msra.mxu1 %v2725_v59 }
 0xa33   : > { %2569 = vmatprep.subr.bf16.mxu1 %v2726_v61 }
 0xa36   : > { %2570 = vmatpush3.bf16.msra.mxu1 %v2726_v61 }
 0xaab   : > { %v1061_v30 = vpop.xlane.xlu1 %1060 }
 0xaac   : > { %v1068_v0 = vmul.f32 0.03125, %v1061_v30 }
 0xaad   : > { %v1064_v2 = vpop.xlane.xlu0 %1063 }
 0xaae   : > { %v1071_v34 = vsub.f32 %v3177_v56, %v1068_v0  ;;  %v1069_v3 = vmul.f32 0.03125, %v1064_v2 }
 0xab0   : > { %v1072_v5 = vsub.f32 %v3180_v58, %v1069_v3  ;;  %v1074_v8 = vmul.f32 %v1071_v34, %v1071_v34 }
 0xab1   : > { %v1067_v9 = vpop.xlane.xlu0 %1066 }
 0xab2   : > { %v1070_v27 = vmul.f32 0.03125, %v1067_v9  ;;  %v1077_v10 = vsel %vm461_vm3, %v1074_v8, 0.0  ;;  %v1075_v11 = vmul.f32 %v1072_v5, %v1072_v5 }
 0xab3   : > { %1078 = vadd.xlane.f32.xlu0 %v1077_v10 }
 0xab4   : > { %v1073_v12 = vsub.f32 %v3185_v60, %v1070_v27  ;;  %v1080_v13 = vsel %vm461_vm3, %v1075_v11, 0.0 }
 0xab5   : > { %1081 = vadd.xlane.f32.xlu1 %v1080_v13 }
 0xab6   : > { %v1076_v14 = vmul.f32 %v1073_v12, %v1073_v12 }
 0xab8   : > { %v1083_v15 = vsel %vm461_vm3, %v1076_v14, 0.0 }
 0xab9   : > { %1084 = vadd.xlane.f32.xlu0 %v1083_v15 }
 0xb40   : > { %v1079_v32 = vpop.xlane.xlu0 %1078 }
 0xb41   : > { %v1086_v18 = vmul.f32 0.03125, %v1079_v32 }
 0xb42   : > { %v1082_v19 = vpop.xlane.xlu1 %1081 }
 0xb43   : > { %v1089_v36 = vadd.f32 1e-06, %v1086_v18  ;;  %v1087_v21 = vmul.f32 0.03125, %v1082_v19 }
 0xb45   : > { %2771 = vrsqrt.f32 %v1089_v36  ;;  %v1090_v22 = vadd.f32 1e-06, %v1087_v21 }
 0xb46   : > { %v1085_v23 = vpop.xlane.xlu0 %1084 }
 0xb47   : > { %2773 = vrsqrt.f32 %v1090_v22  ;;  %v1088_v24 = vmul.f32 0.03125, %v1085_v23 }
 0xb49   : > { %v1091_v25 = vadd.f32 1e-06, %v1088_v24 }
 0xb4b   : > { %2775 = vrsqrt.f32 %v1091_v25 }
 0xb4f   : > { %v2772_v31 = vpop.eup %2771 }
 0xb50   : > { %v1095_v33 = vmul.f32 %v2772_v31, %v1071_v34 }
 0xb51   : > { %v2774_v35 = vpop.eup %2773 }
 0xb52   : > { %v1096_v37 = vmul.f32 %v2774_v35, %v1072_v5  ;;  %v1102_v38 = vmul.f32 %v1101_v28, %v1095_v33 }
 0xb54   : > { %v1103_v40 = vmul.f32 %v1101_v28, %v1096_v37  ;;  %v1109_v46 = vadd.f32 %v1108_v39, %v1102_v38 }
 0xb55   : > { %v2776_v41 = vpop.eup %2775 }
 0xb56   : > { %v1097_v42 = vmul.f32 %v2776_v41, %v1073_v12  ;;  %v1110_v47 = vadd.f32 %v1108_v39, %v1103_v40 }
 0xb58   : > { %v1112_v48 = vpack.c.bf16 %v1110_v47, %v1109_v46  ;;  %v1104_v49 = vmul.f32 %v1101_v28, %v1097_v42  ;;  %v1235_v42 = vsub.s32 7, %v3010_v4  ;;  %v1335_v46 = vsub.s32 5, %v3010_v4 }
 0xb5a   : > { %2551 = vmatprep.mubr.msk.bf16.mxu0 %vm461_vm3, %v1112_v48  ;;  %v1111_v50 = vadd.f32 %v1108_v39, %v1104_v49  ;;  %v1236_v47 = vrot.slane %v3066_v63, %v1235_v42  ;;  %v1336_v49 = vrot.slane %v3066_v63, %v1335_v46 }
 0xb5c   : > { %v1113_v51 = vpack.c.bf16 %v1111_v50, %v1111_v50 }
 0xb5e   : > { %2552 = vmatmul.mubr.msk.bf16.vlgmr.msra.gmra.mrb[8].mxu0 %vm461_vm3, %v1113_v51 }
 0xc31   : > { %v2553_v30 = vpop.f32.mrb[8].mxu0 }
 0xc32   : > { %v1183_v0 = vadd.f32 %v2553_v30, %v1121_v62  ;;  %v1174_v2 = vpop.f32.mrb[9].mxu0 }
 0xc33   : > { %v1175_v34 = vadd.f32 %v1174_v2, %v1121_v62  ;;  %v2554_v3 = vpop.f32.mrb[10].mxu0 }
 0xc34   : > { %v1193_v5 = vmul.f32 0.044715, %v1183_v0  ;;  %v1177_v8 = vpop.f32.mrb[11].mxu0  ;;  %v1190_v28 = vmul.f32 0.5, %v1183_v0 }
 0xc35   : > { %v1191_v9 = vmul.f32 0.044715, %v1175_v34  ;;  %v1178_v27 = vadd.f32 %v1177_v8, %v1121_v62  ;;  %v1188_v31 = vmul.f32 0.5, %v1175_v34 }
 0xc36   : > { %v1196_v10 = vmul.f32 %v1193_v5, %v1183_v0 }
 0xc37   : > { %v1194_v11 = vmul.f32 %v1191_v9, %v1175_v34  ;;  %v1192_v12 = vmul.f32 0.044715, %v1178_v27  ;;  %v1189_v33 = vmul.f32 0.5, %v1178_v27 }
 0xc38   : > { %v1199_v13 = vmul.f32 %v1196_v10, %v1183_v0 }
 0xc39   : > { %v1197_v14 = vmul.f32 %v1194_v11, %v1175_v34  ;;  %v1195_v15 = vmul.f32 %v1192_v12, %v1178_v27 }
 0xc3a   : > { %v1202_v16 = vadd.f32 %v1199_v13, %v1183_v0 }
 0xc3b   : > { %v1198_v17 = vmul.f32 %v1195_v15, %v1178_v27  ;;  %v1200_v32 = vadd.f32 %v1197_v14, %v1175_v34 }
 0xc3c   : > { %v1205_v18 = vmul.f32 0.7978846, %v1202_v16  ;;  %v2727_v16 = vld [vmem:[%s3499_s4 + $0x10] sm:$0xff]  }
 0xc3d   : > { %v1201_v20 = vadd.f32 %v1198_v17, %v1178_v27  ;;  %v1203_v19 = vmul.f32 0.7978846, %v1200_v32  ;;  %v2728_v17 = vld [vmem:[%s3499_s4 + $0x18] sm:$0xff]   ;;  %2575 = vmatprep.subr.bf16.mxu0 %v2727_v16 }
 0xc3e   : > { %2777 = vtanh.f32 %v1205_v18  ;;  %2576 = vmatpush3.bf16.msra.mxu0 %v2727_v16 }
 0xc3f   : > { %v1204_v36 = vmul.f32 0.7978846, %v1201_v20  ;;  %2779 = vtanh.f32 %v1203_v19  ;;  %2577 = vmatprep.subr.bf16.mxu0 %v2728_v17 }
 0xc41   : > { %2781 = vtanh.f32 %v1204_v36 }
 0xc42   : > { %2578 = vmatpush3.bf16.msra.mxu0 %v2728_v17 }
 0xc48   : > { %v2778_v21 = vpop.eup %2777 }
 0xc49   : > { %v2780_v22 = vpop.eup %2779  ;;  %v1211_v23 = vadd.f32 1.0, %v2778_v21 }
 0xc4a   : > { %v1209_v24 = vadd.f32 1.0, %v2780_v22 }
 0xc4b   : > { %v2782_v25 = vpop.eup %2781  ;;  %v1214_v37 = vmul.f32 %v1211_v23, %v1190_v28 }
 0xc4c   : > { %v1210_v35 = vadd.f32 1.0, %v2782_v25  ;;  %v1212_v38 = vmul.f32 %v1209_v24, %v1188_v31  ;;  %v3277_v25 = vld [vmem:[%s3503_s8 + $0x10] sm:$0xff] }
 0xc4d   : > { %v1216_v41 = vpack.c.bf16 %v1214_v37, %v1214_v37  ;;  %v1388_v28 = vrot.slane %v3277_v25, %v3016_v6 }
 0xc4e   : > { %v1213_v39 = vmul.f32 %v1210_v35, %v1189_v33 }
 0xc50   : > { %v1215_v40 = vpack.c.bf16 %v1213_v39, %v1212_v38  ;;  %v1395_v39 = vrot.slane %v3277_v25, %v3019_v7 }
 0xc52   : > { %2571 = vmatprep.mubr.bf16.mxu1 %v1215_v40 }
 0xc53   : > { %2572 = vmatmul.mubr.bf16.vlgmr.msra.gmra.mrb[20].mxu1 %v1216_v41 }
 0xd26   : > { %v2573_v48 = vpop.f32.mrb[20].mxu1 }
 0xd27   : > { %v1328_v50 = vadd.f32 %v2573_v48, %v1236_v47  ;;  %v1319_v51 = vpop.f32.mrb[21].mxu1 }
 0xd28   : > { %v1320_v52 = vadd.f32 %v1319_v51, %v1236_v47  ;;  %v2574_v53 = vpop.f32.mrb[22].mxu1 }
 0xd29   : > { %v1322_v1 = vpop.f32.mrb[23].mxu1  ;;  %v1339_v54 = vmul.f32 %v1336_v49, %v1328_v50 }
 0xd2a   : > { %v1337_v55 = vmul.f32 %v1336_v49, %v1320_v52  ;;  %v1323_v57 = vadd.f32 %v1322_v1, %v1236_v47  ;;  %v3288_v1 = vld [vmem:[%s3503_s8 + $0x18] sm:$0x3] }
 0xd2b   : > { %v3251_v62 = vadd.f32 %v1339_v54, %v3185_v60  ;;  %v1409_v54 = vrot.slane %v3288_v1, %v3019_v7 }
 0xd2c   : > { %v3248_v59 = vadd.f32 %v1337_v55, %v3177_v56  ;;  %v1338_v61 = vmul.f32 %v1336_v49, %v1323_v57 }
 0xd2d   : > { %v1352_v2 = vsel %vm461_vm3, %v3251_v62, 0.0 }
 0xd2e   : > { %v3254_v30 = vadd.f32 %v1338_v61, %v3180_v58  ;;  %v1346_v63 = vsel %vm461_vm3, %v3248_v59, 0.0 }
 0xd2f   : > { %1347 = vadd.xlane.f32.xlu1 %v1346_v63 }
 0xd30   : > { %v1349_v0 = vsel %vm461_vm3, %v3254_v30, 0.0 }
 0xd31   : > { %1350 = vadd.xlane.f32.xlu0 %v1349_v0 }
 0xd33   : > { %1353 = vadd.xlane.f32.xlu1 %v1352_v2 }
 0xdbc   : > { %v1348_v56 = vpop.xlane.xlu1 %1347 }
 0xdbd   : > { %v1355_v34 = vmul.f32 0.03125, %v1348_v56 }
 0xdbe   : > { %v1351_v3 = vpop.xlane.xlu0 %1350 }
 0xdbf   : > { %v1358_v60 = vsub.f32 %v3248_v59, %v1355_v34  ;;  %v1356_v5 = vmul.f32 0.03125, %v1351_v3 }
 0xdc0   : > { %v1354_v58 = vpop.xlane.xlu1 %1353 }
 0xdc1   : > { %v1359_v8 = vsub.f32 %v3254_v30, %v1356_v5  ;;  %v1357_v9 = vmul.f32 0.03125, %v1354_v58  ;;  %v1361_v27 = vmul.f32 %v1358_v60, %v1358_v60 }
 0xdc3   : > { %v1360_v10 = vsub.f32 %v3251_v62, %v1357_v9  ;;  %v1364_v11 = vsel %vm461_vm3, %v1361_v27, 0.0  ;;  %v1362_v12 = vmul.f32 %v1359_v8, %v1359_v8 }
 0xdc4   : > { %1365 = vadd.xlane.f32.xlu0 %v1364_v11 }
 0xdc5   : > { %v1367_v13 = vsel %vm461_vm3, %v1362_v12, 0.0  ;;  %v1363_v14 = vmul.f32 %v1360_v10, %v1360_v10 }
 0xdc6   : > { %1368 = vadd.xlane.f32.xlu1 %v1367_v13 }
 0xdc7   : > { %v1370_v15 = vsel %vm461_vm3, %v1363_v14, 0.0 }
 0xdc8   : > { %1371 = vadd.xlane.f32.xlu0 %v1370_v15 }
 0xe51   : > { %v1366_v32 = vpop.xlane.xlu0 %1365 }
 0xe52   : > { %v1373_v18 = vmul.f32 0.03125, %v1366_v32 }
 0xe53   : > { %v1369_v20 = vpop.xlane.xlu1 %1368 }
 0xe54   : > { %v1376_v19 = vadd.f32 1e-06, %v1373_v18  ;;  %v1374_v36 = vmul.f32 0.03125, %v1369_v20 }
 0xe55   : > { %v1372_v21 = vpop.xlane.xlu0 %1371 }
 0xe56   : > { %2783 = vrsqrt.f32 %v1376_v19  ;;  %v1377_v22 = vadd.f32 1e-06, %v1374_v36  ;;  %v1375_v23 = vmul.f32 0.03125, %v1372_v21 }
 0xe58   : > { %2785 = vrsqrt.f32 %v1377_v22  ;;  %v1378_v24 = vadd.f32 1e-06, %v1375_v23 }
 0xe5a   : > { %2787 = vrsqrt.f32 %v1378_v24 }
 0xe60   : > { %v2784_v31 = vpop.eup %2783 }
 0xe61   : > { %v1382_v33 = vmul.f32 %v2784_v31, %v1358_v60 }
 0xe62   : > { %v2786_v35 = vpop.eup %2785 }
 0xe63   : > { %v1383_v37 = vmul.f32 %v2786_v35, %v1359_v8  ;;  %v1389_v38 = vmul.f32 %v1388_v28, %v1382_v33 }
 0xe64   : > { %v2788_v40 = vpop.eup %2787 }
 0xe65   : > { %v1384_v41 = vmul.f32 %v2788_v40, %v1360_v10  ;;  %v1390_v47 = vmul.f32 %v1388_v28, %v1383_v37  ;;  %v1396_v48 = vadd.f32 %v1395_v39, %v1389_v38 }
 0xe67   : > { %v1397_v49 = vadd.f32 %v1395_v39, %v1390_v47  ;;  %v1391_v50 = vmul.f32 %v1388_v28, %v1384_v41 }
 0xe69   : > { %v1399_v51 = vpack.c.bf16 %v1397_v49, %v1396_v48  ;;  %v1398_v52 = vadd.f32 %v1395_v39, %v1391_v50 }
 0xe6b   : > { %2579 = vmatprep.mubr.msk.bf16.mxu0 %vm461_vm3, %v1399_v51  ;;  %v1400_v53 = vpack.c.bf16 %v1398_v52, %v1398_v52 }
 0xe6d   : > { %2580 = vmatmul.mubr.msk.bf16.vlgmr.msra.gmra.mrb[12].mxu0 %vm461_vm3, %v1400_v53 }
 0xf40   : > { %v2581_v55 = vpop.f32.mrb[12].mxu0 }
 0xf41   : > { %v1471_v57 = vadd.f32 %v2581_v55, %v1409_v54  ;;  %v1462_v61 = vpop.f32.mrb[13].mxu0 }
 0xf42   : > { %v1463_v63 = vadd.f32 %v1462_v61, %v1409_v54  ;;  %v2582_v0 = vpop.f32.mrb[14].mxu0 }
 0xf43   : > { %1478 = vst.msk [vmem:[#allocation2 + $0x10] sm:$0xff] %vm592_vm4, %v1471_v57  ;;  %v1465_v2 = vpop.f32.mrb[15].mxu0 }
 0xf44   : > { %1476 = vst.msk [vmem:[#allocation2] sm:$0xff] %vm592_vm4, %v1463_v63  ;;  %v1466_v56 = vadd.f32 %v1465_v2, %v1409_v54 }
 0xf46   : > { %1477 = vst.msk [vmem:[#allocation2 + $0x8] sm:$0xff] %vm592_vm4, %v1466_v56 }
 0xf4a   : > { %v1481_v34 = vld [vmem:[#allocation2 + $0x10] sm:$0xff] }
 0xf4b   : > { %v3295_v3 = vpack.c.bf16 %v1481_v34, %v1481_v34  ;;  %v1479_v7 = vld [vmem:[#allocation2] sm:$0xff] }
 0xf4d   : > { %1488 = vrot.lane.b32.xlu0 %v3295_v3, %s2892_s24  ;;  %v1480_v60 = vld [vmem:[#allocation2 + $0x8] sm:$0xff] }
 0xf4e   : > { %v3299_v5 = vpack.c.bf16 %v1480_v60, %v1479_v7 }
 0xf50   : > { %1486 = vrot.lane.b32.xlu1 %v3299_v5, %s2892_s24  ;;  %2587 = vmatprep.mubr.msk.bf16.mxu0 %vm607_vm5, %v3299_v5  ;;  %s3511_s24 = smov 48  }
 0xf51   : > { %1665 = vrot.lane.b32.xlu0 %v3295_v3, %s2895_s26 }
 0xf54   : > { %1667 = vrot.lane.b32.xlu1 %v3299_v5, %s2896_s27 }
 0xf58   : > { %1669 = vrot.lane.b32.xlu1 %v3295_v3, %s2896_s27 }
 0xf5c   : > { %1663 = vrot.lane.b32.xlu1 %v3299_v5, %s2895_s26  ;;  %s323_s26 = sand.u32 1, %s2882_s10  }
 0xf5d   : > { %s324_s22 = scalar_lea.vmem [#allocation4], %s323_s26  ;;  %s2242_s21 = scalar_lea.sflag [#allocation5], %s323_s26 }
 0xf5e   : > { %s2254_s23 = sshll.u32 %s324_s22, 4  ;;  %s3454_s23 = int_to_ptr.vmem [resolvable:$true] %s2254_s23 }
 0xfbf   : > { %v1489_v9 = vpop.permute.xlu0 %1488 }
 0xfc0   : > { %v1500_v12 = vsel %vm607_vm5, %v1489_v9, 0 }
 0xfc2   : > { %v1487_v58 = vpop.permute.xlu1 %1486 }
 0xfc3   : > { %v1497_v8 = vsel %vm607_vm5, %v1487_v58, 0  ;;  %2657 = vmatprep.subr.msk.bf16.mxu0 %vm607_vm5, %v1487_v58  ;;  %v1666_v15 = vpop.permute.xlu0 %1665 }
 0xfc4   : > { %2584 = vmatpush3.bf16.xpose.msra.mxu0 %v1497_v8 }
 0xfc5   : > { %2658 = vmatprep.subr.msk.bf16.mxu0 %vm607_vm5, %v1489_v9 }
 0xfc6   : > { %v1668_v27 = vpop.permute.xlu1 %1667 }
 0xfc7   : > { %v1678_v10 = vsel %vm607_vm5, %v1668_v27, 0  ;;  %2660 = vmatprep.subr.msk.bf16.mxu1 %vm607_vm5, %v1668_v27 }
 0xfc8   : > { %2600 = vmatpush3.bf16.xpose.msra.mxu1 %v1678_v10 }
 0xfca   : > { %v1670_v11 = vpop.permute.xlu1 %1669 }
 0xfcb   : > { %2661 = vmatprep.subr.msk.bf16.mxu1 %vm607_vm5, %v1670_v11  ;;  %v1681_v14 = vsel %vm607_vm5, %v1670_v11, 0 }
 0xfcc   : > { %2586 = vmatpush3.bf16.xpose.msra.mxu0 %v1500_v12 }
 0xfce   : > { %v1664_v13 = vpop.permute.xlu1 %1663 }
 0xfcf   : > { %2603 = vmatprep.mubr.msk.bf16.mxu1 %vm607_vm5, %v1664_v13 }
 0xfd0   : > { %2602 = vmatpush3.bf16.xpose.msra.mxu1 %v1681_v14 }
 0xfd3   : > { %2588 = vmatmul.mubr.msk.bf16.vlgmr.msra.gmra.mrb[16].mxu0 %vm607_vm5, %v3295_v3 }
 0xfd7   : > { %2604 = vmatmul.mubr.msk.bf16.vlgmr.msra.gmra.mrb[24].mxu1 %vm607_vm5, %v1666_v15 }
0x10a6   : > { %v2589_v16 = vpop.f32.mrb[16].mxu0 }
0x10a7   : > { %v1536_v17 = vpop.f32.mrb[17].mxu0  ;;  %v1552_v19 = vmul.f32 0.25, %v2589_v16 }
0x10a8   : > { %v1550_v32 = vmul.f32 0.25, %v1536_v17  ;;  %v2590_v18 = vpop.f32.mrb[18].mxu0 }
0x10a9   : > { %v1539_v20 = vpop.f32.mrb[19].mxu0  ;;  %v1555_v39 = vadd.f32 %v1552_v19, %v3101_v45 }
0x10aa   : > { %v1551_v36 = vmul.f32 0.25, %v1539_v20  ;;  %v2605_v21 = vpop.f32.mrb[24].mxu1  ;;  %v1553_v22 = vadd.f32 %v1550_v32, %v3101_v45 }
0x10ab   : > { %v1717_v23 = vpop.f32.mrb[25].mxu1  ;;  %v1733_v41 = vmul.f32 0.25, %v2605_v21  ;;  %v1562_v48 = vsel %vm674_vm7, %v1555_v39, -inf }
0x10ac   : > { %v2606_v24 = vpop.f32.mrb[26].mxu1  ;;  %v1556_v28 = vsel %vm674_vm7, %v1553_v22, -inf  ;;  %v1554_v31 = vadd.f32 %v1551_v36, %v3101_v45  ;;  %v1731_v35 = vmul.f32 0.25, %v1717_v23 }
0x10ad   : > { %v1720_v33 = vpop.f32.mrb[27].mxu1  ;;  %1557 = vmax.xlane.f32.xlu1 %v1556_v28  ;;  %v1736_v51 = vadd.f32 %v1733_v41, %v3101_v45 }
0x10ae   : > { %v1732_v37 = vmul.f32 0.25, %v1720_v33  ;;  %v1559_v38 = vsel %vm674_vm7, %v1554_v31, -inf  ;;  %v1734_v49 = vadd.f32 %v1731_v35, %v3101_v45 }
0x10af   : > { %1560 = vmax.xlane.f32.xlu0 %v1559_v38  ;;  %v1743_v52 = vsel %vm674_vm7, %v1736_v51, -inf }
0x10b0   : > { %v1735_v40 = vadd.f32 %v1732_v37, %v3101_v45  ;;  %v1737_v50 = vsel %vm674_vm7, %v1734_v49, -inf }
0x10b2   : > { %v1740_v47 = vsel %vm674_vm7, %v1735_v40, -inf }
0x10b3   : > { %1741 = vmax.xlane.f32.xlu1 %v1740_v47  ;;  %1563 = vmax.xlane.f32.xlu0 %v1562_v48 }
0x10b7   : > { %1738 = vmax.xlane.f32.xlu0 %v1737_v50 }
0x10bb   : > { %1744 = vmax.xlane.f32.xlu0 %v1743_v52 }
0x10c4   : > { %1591 = vrot.lane.b32.xlu1 %v3299_v5, %s2894_s25 }
0x113a   : > { %v1558_v53 = vpop.xlane.xlu1 %1557 }
0x113b   : > { %v1565_v55 = vsub.f32 %v1553_v22, %v1558_v53 }
0x113c   : > { %v1561_v54 = vpop.xlane.xlu0 %1560 }
0x113d   : > { %v1568_v2 = vmul.f32 1.442695, %v1565_v55  ;;  %v1566_v58 = vsub.f32 %v1554_v31, %v1561_v54 }
0x113f   : > { %v1570_v27 = vmul.f32 1.442695, %v1566_v58 }
0x1140   : > { %v1742_v57 = vpop.xlane.xlu1 %1741  ;;  %v1564_v61 = vpop.xlane.xlu0 %1563 }
0x1141   : > { %v1567_v63 = vsub.f32 %v1555_v39, %v1564_v61  ;;  %v1747_v20 = vsub.f32 %v1735_v40, %v1742_v57 }
0x1143   : > { %v1572_v0 = vmul.f32 1.442695, %v1567_v63  ;;  %v1751_v19 = vmul.f32 1.442695, %v1747_v20  ;;  %v1932_v20 = vrot.slane %v3277_v25, %v1051_v44 }
0x1144   : > { %v1592_v56 = vpop.permute.xlu1 %1591  ;;  %v1739_v34 = vpop.xlane.xlu0 %1738 }
0x1145   : > { %2591 = vmatprep.subr.bf16.mxu0 %v1592_v56  ;;  %2789 = vpow2.f32 %v1572_v0  ;;  %v1746_v45 = vsub.f32 %v1734_v49, %v1739_v34 }
0x1146   : > { %2592 = vmatpush3.bf16.msra.mxu0 %v1592_v56  ;;  %2791 = vpow2.f32 %v1568_v2 }
0x1147   : > { %v1749_v8 = vmul.f32 1.442695, %v1746_v45 }
0x1148   : > { %v1745_v7 = vpop.xlane.xlu0 %1744 }
0x1149   : > { %v1748_v60 = vsub.f32 %v1736_v51, %v1745_v7  ;;  %v2729_v7 = vld [vmem:[%s3500_s5 + $0x10] sm:$0xff]  }
0x114b   : > { %v1753_v9 = vmul.f32 1.442695, %v1748_v60  ;;  %v2730_v60 = vld [vmem:[%s3500_s5 + $0x18] sm:$0xff]  }
0x114d   : > { %2793 = vpow2.f32 %v1753_v9 }
0x114e   : > { %2795 = vpow2.f32 %v1749_v8 }
0x114f   : > { %v2790_v10 = vpop.eup %2789  ;;  %2797 = vpow2.f32 %v1570_v27 }
0x1150   : > { %v1580_v11 = vsel %vm674_vm7, %v2790_v10, 0.0  ;;  %v2792_v12 = vpop.eup %2791  ;;  %2799 = vpow2.f32 %v1751_v19 }
0x1151   : > { %1581 = vadd.xlane.f32.xlu1 %v1580_v11  ;;  %v1574_v13 = vsel %vm674_vm7, %v2792_v12, 0.0 }
0x1155   : > { %1575 = vadd.xlane.f32.xlu1 %v1574_v13 }
0x1157   : > { %v2794_v14 = vpop.eup %2793 }
0x1158   : > { %v1761_v15 = vsel %vm674_vm7, %v2794_v14, 0.0  ;;  %v2796_v16 = vpop.eup %2795 }
0x1159   : > { %1762 = vadd.xlane.f32.xlu0 %v1761_v15  ;;  %v1755_v17 = vsel %vm674_vm7, %v2796_v16, 0.0  ;;  %v2798_v32 = vpop.eup %2797 }
0x115a   : > { %v1577_v18 = vsel %vm674_vm7, %v2798_v32, 0.0  ;;  %v2800_v36 = vpop.eup %2799 }
0x115b   : > { %v1758_v21 = vsel %vm674_vm7, %v2800_v36, 0.0 }
0x115d   : > { %1756 = vadd.xlane.f32.xlu0 %v1755_v17 }
0x1161   : > { %1578 = vadd.xlane.f32.xlu0 %v1577_v18 }
0x1166   : > { %1772 = vrot.lane.b32.xlu1 %v3299_v5, %s3511_s24 }
0x1177   : > { %1593 = vrot.lane.b32.xlu0 %v3295_v3, %s2894_s25 }
0x118a   : > { %1759 = vadd.xlane.f32.xlu1 %v1758_v21 }
0x119b   : > { %1774 = vrot.lane.b32.xlu1 %v3295_v3, %s3511_s24  ;;  %s2828_s24 = scalar_lea.vmem %s3454_s23, 16 }
0x119c   : > { %p2829_p11 = scmp.ne.s32.totalorder %s3454_s23, %s2828_s24 }
0x119e   : > { %p2830_p12 = pnand %p2829_p11, %p2988_p5 }
0x11a0   : > { %p2831_p13 = pneg %p2830_p12 }
0x11de   : > { %v1582_v22 = vpop.xlane.xlu1 %1581 }
0x11df   : > { %2801 = vrcp.f32 %v1582_v22 }
0x11e2   : > { %v1576_v24 = vpop.xlane.xlu1 %1575 }
0x11e3   : > { %2803 = vrcp.f32 %v1576_v24 }
0x11e6   : > { %v1763_v23 = vpop.xlane.xlu0 %1762  ;;  %v1773_v35 = vpop.permute.xlu1 %1772 }
0x11e9   : > { %v2802_v37 = vpop.eup %2801 }
0x11ea   : > { %v1757_v28 = vpop.xlane.xlu0 %1756  ;;  %v1588_v3 = vmul.f32 %v2802_v37, %v2790_v10 }
0x11ec   : > { %v1590_v48 = vpack.c.bf16 %v1588_v3, %v1588_v3 }
0x11ed   : > { %v2804_v38 = vpop.eup %2803 }
0x11ee   : > { %v1579_v5 = vpop.xlane.xlu0 %1578  ;;  %v1586_v40 = vmul.f32 %v2804_v38, %v2792_v12 }
0x11ef   : > { %2805 = vrcp.f32 %v1579_v5 }
0x11f0   : > { %2807 = vrcp.f32 %v1763_v23 }
0x11f1   : > { %2809 = vrcp.f32 %v1757_v28 }
0x11f2   : > { %v1594_v31 = vpop.permute.xlu0 %1593 }
0x11f3   : > { %v1603_v33 = vsel %vm721_vm8, %v1594_v31, 0  ;;  %2659 = vmatprep.subr.msk.bf16.mxu0 %vm721_vm8, %v1594_v31 }
0x11f4   : > { %2594 = vmatpush3.bf16.msra.mxu0 %v1603_v33 }
0x11f5   : > { %2607 = vmatprep.subr.bf16.mxu0 %v1773_v35 }
0x11f9   : > { %v2806_v39 = vpop.eup %2805 }
0x11fa   : > { %v1587_v41 = vmul.f32 %v2806_v39, %v2798_v32  ;;  %v2808_v52 = vpop.eup %2807  ;;  %v1862_v32 = vrot.slane %v3277_v25, %v981_v43 }
0x11fb   : > { %v2810_v53 = vpop.eup %2809  ;;  %v1769_v55 = vmul.f32 %v2808_v52, %v2794_v14 }
0x11fc   : > { %v1589_v47 = vpack.c.bf16 %v1587_v41, %v1586_v40  ;;  %v1767_v57 = vmul.f32 %v2810_v53, %v2796_v16 }
0x11fd   : > { %v1771_v0 = vpack.c.bf16 %v1769_v55, %v1769_v55  ;;  %v2731_v55 = vld [vmem:[%s3501_s6 + $0x10] sm:$0xff]  }
0x11fe   : > { %2595 = vmatprep.mubr.msk.bf16.mxu0 %vm674_vm7, %v1589_v47  ;;  %2623 = vmatprep.subr.bf16.mxu1 %v2731_v55 }
0x11ff   : > { %2596 = vmatmul.mubr.msk.bf16.vlgmr.msra.gmra.mrb[20].mxu0 %vm674_vm7, %v1590_v48  ;;  %2624 = vmatpush3.bf16.msra.mxu1 %v2731_v55 }
0x1200   : > { %2608 = vmatpush3.bf16.msra.mxu0 %v1773_v35 }
0x1217   : > { %v1760_v49 = vpop.xlane.xlu1 %1759 }
0x1218   : > { %2811 = vrcp.f32 %v1760_v49 }
0x121b   : > { %v1775_v50 = vpop.permute.xlu1 %1774 }
0x121c   : > { %v1784_v51 = vsel %vm721_vm8, %v1775_v50, 0  ;;  %2662 = vmatprep.subr.msk.bf16.mxu0 %vm721_vm8, %v1775_v50 }
0x121d   : > { %2610 = vmatpush3.bf16.msra.mxu0 %v1784_v51 }
0x121e   : > { %2615 = vmatprep.subr.bf16.mxu0 %v2729_v7 }
0x1222   : > { %v2812_v54 = vpop.eup %2811 }
0x1223   : > { %v1768_v61 = vmul.f32 %v2812_v54, %v2800_v36 }
0x1225   : > { %v1770_v63 = vpack.c.bf16 %v1768_v61, %v1767_v57  ;;  %v2732_v57 = vld [vmem:[%s3501_s6 + $0x18] sm:$0xff]  }
0x1226   : > { %2625 = vmatprep.subr.bf16.mxu1 %v2732_v57 }
0x1227   : > { %2611 = vmatprep.mubr.msk.bf16.mxu0 %vm674_vm7, %v1770_v63  ;;  %2626 = vmatpush3.bf16.msra.mxu1 %v2732_v57 }
0x1228   : > { %2612 = vmatmul.mubr.msk.bf16.vlgmr.msra.gmra.mrb[24].mxu0 %vm674_vm7, %v1771_v0 }
0x1229   : > { %2616 = vmatpush3.bf16.msra.mxu0 %v2729_v7 }
0x122a   : > { %2617 = vmatprep.subr.bf16.mxu0 %v2730_v60 }
0x122d   : > { %2618 = vmatpush3.bf16.msra.mxu0 %v2730_v60 }
0x12d2   : > { %v2597_v2 = vpop.f32.mrb[20].mxu0 }
0x12d3   : > { %1655 = vst.msk [vmem:[#allocation3 + $0x10] sm:$0xff] %vm607_vm5, %v2597_v2  ;;  %v1639_v56 = vpop.f32.mrb[21].mxu0 }
0x12d4   : > { %1653 = vst.msk [vmem:[#allocation3] sm:$0xff] %vm607_vm5, %v1639_v56  ;;  %v2598_v34 = vpop.f32.mrb[22].mxu0 }
0x12d5   : > { %v1642_v45 = vpop.f32.mrb[23].mxu0 }
0x12d6   : > { %1654 = vst.msk [vmem:[#allocation3 + $0x8] sm:$0xff] %vm607_vm5, %v1642_v45 }
0x12fb   : > { %v2613_v58 = vpop.f32.mrb[24].mxu0 }
0x12fc   : > { %v1820_v8 = vpop.f32.mrb[25].mxu0 }
0x12fd   : > { %1837 = vrot.lane.b32.xlu1 %v1820_v8, %s3512_s17  ;;  %v2614_v9 = vpop.f32.mrb[26].mxu0 }
0x12fe   : > { %v1823_v27 = vpop.f32.mrb[27].mxu0  ;;  %v1981_v9 = vrot.slane %v3277_v25, %v1100_v26  ;;  %v2733_v26 = vld [vmem:[%s3502_s7 + $0x40] sm:$0xff]  }
0x12ff   : > { %1839 = vrot.lane.b32.xlu0 %v1823_v27, %s3512_s17  ;;  %2631 = vmatprep.subr.bf16.mxu0 %v2733_v26 }
0x1301   : > { %1841 = vrot.lane.b32.xlu1 %v2613_v58, %s3512_s17  ;;  %s2405_s17 = sshll.u32 %s2971_s13, 4  ;;  %s2899_s13 = smov [#allocation4]  }
0x1302   : > { %s3452_s28 = scalar_lea.hbm %s3504_s9, %s2405_s17  ;;  %s2832_s25 = sshll.u32 %s2899_s13, 4  ;;  %s2833_s25 = int_to_ptr.vmem [resolvable:$false] %s2832_s25 }
0x1303   : > { %s2834_s27 = scalar_lea.vmem %s2833_s25, 32  ;;  %p2835_p0 = scmp.lt.s32.totalorder %s3454_s23, %s2833_s25 }
0x1304   : > { %p2836_p1 = scmp.lt.s32.totalorder %s2834_s27, %s2828_s24 }
0x1306   : > { %p2837_p2 = por %p2836_p1, %p2835_p0 }
0x1308   : > { %p2838_p3 = pnand %p2837_p2, %p2831_p13 }
0x136f   : > { %v1838_v10 = vpop.permute.xlu1 %1837 }
0x1370   : > { %1846 = vst.msk [vmem:[#allocation3] sm:$0xff] %vm966_vm9, %v1838_v10 }
0x1371   : > { %v1840_v11 = vpop.permute.xlu0 %1839 }
0x1372   : > { %1847 = vst.msk [vmem:[#allocation3 + $0x8] sm:$0xff] %vm966_vm9, %v1840_v11 }
0x1373   : > { %v1842_v12 = vpop.permute.xlu1 %1841 }
0x1374   : > { %1848 = vst.msk [vmem:[#allocation3 + $0x10] sm:$0xff] %vm966_vm9, %v1842_v12 }
0x1377   : > { %v1849_v13 = vld [vmem:[#allocation3] sm:$0xff] }
0x1379   : > { %v1850_v14 = vld [vmem:[#allocation3 + $0x8] sm:$0xff] }
0x137a   : > { %v1852_v15 = vpack.c.bf16 %v1850_v14, %v1849_v13  ;;  %v1988_v14 = vrot.slane %v3277_v25, %v1107_v29  ;;  %v2734_v29 = vld [vmem:[%s3502_s7 + $0x48] sm:$0xff]  }
0x137b   : > { %v1851_v16 = vld [vmem:[#allocation3 + $0x10] sm:$0xff] }
0x137c   : > { %2619 = vmatprep.mubr.msk.bf16.mxu0 %vm461_vm3, %v1852_v15  ;;  %v1853_v17 = vpack.c.bf16 %v1851_v16, %v1851_v16 }
0x137e   : > { %2620 = vmatmul.mubr.msk.bf16.vlgmr.msra.gmra.mrb[28].mxu0 %vm461_vm3, %v1853_v17 }
0x137f   : > { %2632 = vmatpush3.bf16.msra.mxu0 %v2733_v26 }
0x1380   : > { %2633 = vmatprep.subr.bf16.mxu0 %v2734_v29 }
0x1383   : > { %2634 = vmatpush3.bf16.msra.mxu0 %v2734_v29 }
0x1451   : > { %v2621_v18 = vpop.f32.mrb[28].mxu0 }
0x1452   : > { %v1924_v19 = vadd.f32 %v2621_v18, %v1862_v32  ;;  %v1915_v36 = vpop.f32.mrb[29].mxu0 }
0x1453   : > { %v1916_v21 = vadd.f32 %v1915_v36, %v1862_v32  ;;  %v2622_v22 = vpop.f32.mrb[30].mxu0  ;;  %v2735_v36 = vld [vmem:[%s3502_s7 + $0x50] sm:$0xff]  }
0x1454   : > { %v1918_v23 = vpop.f32.mrb[31].mxu0  ;;  %v1935_v24 = vmul.f32 %v1932_v20, %v1924_v19  ;;  %2635 = vmatprep.subr.bf16.mxu0 %v2735_v36  ;;  %v2737_v22 = vld [vmem:[%s3502_s7 + $0x60] sm:$0xff]  }
0x1455   : > { %v1933_v28 = vmul.f32 %v1932_v20, %v1916_v21  ;;  %v1919_v5 = vadd.f32 %v1918_v23, %v1862_v32  ;;  %v2736_v21 = vld [vmem:[%s3502_s7 + $0x58] sm:$0xff]   ;;  %2636 = vmatpush3.bf16.msra.mxu0 %v2735_v36  ;;  %v2738_v23 = vld [vmem:[%s3502_s7 + $0x68] sm:$0xff]  }
0x1456   : > { %v1938_v37 = vadd.f32 %v1935_v24, %v3251_v62  ;;  %2637 = vmatprep.subr.bf16.mxu0 %v2736_v21  ;;  %v2739_v24 = vld [vmem:[%s3502_s7 + $0x70] sm:$0xff]  }
0x1457   : > { %v3383_v31 = vadd.f32 %v1933_v28, %v3248_v59  ;;  %v1934_v33 = vmul.f32 %v1932_v20, %v1919_v5  ;;  %v2740_v28 = vld [vmem:[%s3502_s7 + $0x78] sm:$0xff]   ;;  %v2002_v5 = vrot.slane %v3288_v1, %v3016_v6 }
0x1458   : > { %v1945_v38 = vsel %vm461_vm3, %v1938_v37, 0.0 }
0x1459   : > { %v1939_v43 = vsel %vm461_vm3, %v3383_v31, 0.0  ;;  %v1937_v35 = vadd.f32 %v1934_v33, %v3254_v30  ;;  %2638 = vmatpush3.bf16.msra.mxu0 %v2736_v21 }
0x145a   : > { %1940 = vadd.xlane.f32.xlu0 %v1939_v43  ;;  %2639 = vmatprep.subr.bf16.mxu0 %v2737_v22 }
0x145b   : > { %v1942_v44 = vsel %vm461_vm3, %v1937_v35, 0.0 }
0x145c   : > { %1943 = vadd.xlane.f32.xlu1 %v1942_v44 }
0x145d   : > { %2640 = vmatpush3.bf16.msra.mxu0 %v2737_v22 }
0x145e   : > { %1946 = vadd.xlane.f32.xlu0 %v1945_v38  ;;  %2641 = vmatprep.subr.bf16.mxu0 %v2738_v23 }
0x1461   : > { %2642 = vmatpush3.bf16.msra.mxu0 %v2738_v23 }
0x1462   : > { %2643 = vmatprep.subr.bf16.mxu0 %v2739_v24 }
0x1465   : > { %2644 = vmatpush3.bf16.msra.mxu0 %v2739_v24 }
0x1466   : > { %2645 = vmatprep.subr.bf16.mxu0 %v2740_v28 }
0x1469   : > { %2646 = vmatpush3.bf16.msra.mxu0 %v2740_v28 }
0x14e7   : > { %v1941_v39 = vpop.xlane.xlu0 %1940 }
0x14e8   : > { %v1948_v3 = vmul.f32 0.03125, %v1941_v39 }
0x14e9   : > { %v1944_v40 = vpop.xlane.xlu1 %1943 }
0x14ea   : > { %v1951_v59 = vsub.f32 %v3383_v31, %v1948_v3  ;;  %v1949_v41 = vmul.f32 0.03125, %v1944_v40 }
0x14eb   : > { %v1947_v47 = vpop.xlane.xlu0 %1946 }
0x14ec   : > { %v1952_v48 = vsub.f32 %v1937_v35, %v1949_v41  ;;  %v1950_v49 = vmul.f32 0.03125, %v1947_v47  ;;  %v1954_v50 = vmul.f32 %v1951_v59, %v1951_v59 }
0x14ee   : > { %v1953_v30 = vsub.f32 %v1938_v37, %v1950_v49  ;;  %v1957_v62 = vsel %vm461_vm3, %v1954_v50, 0.0  ;;  %v1955_v51 = vmul.f32 %v1952_v48, %v1952_v48 }
0x14ef   : > { %1958 = vadd.xlane.f32.xlu0 %v1957_v62 }
0x14f0   : > { %v1956_v52 = vmul.f32 %v1953_v30, %v1953_v30  ;;  %v1960_v53 = vsel %vm461_vm3, %v1955_v51, 0.0 }
0x14f2   : > { %v1963_v54 = vsel %vm461_vm3, %v1956_v52, 0.0 }
0x14f3   : > { %1961 = vadd.xlane.f32.xlu0 %v1960_v53  ;;  %1964 = vadd.xlane.f32.xlu1 %v1963_v54 }
0x157c   : > { %v1959_v61 = vpop.xlane.xlu0 %1958 }
0x157d   : > { %v1966_v63 = vmul.f32 0.03125, %v1959_v61 }
0x157f   : > { %v1969_v0 = vadd.f32 1e-06, %v1966_v63 }
0x1580   : > { %v1965_v2 = vpop.xlane.xlu1 %1964  ;;  %v1962_v56 = vpop.xlane.xlu0 %1961 }
0x1581   : > { %2813 = vrsqrt.f32 %v1969_v0  ;;  %v1968_v34 = vmul.f32 0.03125, %v1965_v2  ;;  %v1967_v45 = vmul.f32 0.03125, %v1962_v56 }
0x1583   : > { %v1971_v7 = vadd.f32 1e-06, %v1968_v34  ;;  %v1970_v60 = vadd.f32 1e-06, %v1967_v45 }
0x1585   : > { %2815 = vrsqrt.f32 %v1971_v7 }
0x1586   : > { %2817 = vrsqrt.f32 %v1970_v60 }
0x158b   : > { %v2814_v58 = vpop.eup %2813 }
0x158c   : > { %v1975_v8 = vmul.f32 %v2814_v58, %v1951_v59 }
0x158e   : > { %v1982_v13 = vmul.f32 %v1981_v9, %v1975_v8 }
0x158f   : > { %v2816_v27 = vpop.eup %2815 }
0x1590   : > { %v2818_v10 = vpop.eup %2817  ;;  %v1977_v11 = vmul.f32 %v2816_v27, %v1953_v30  ;;  %v1989_v32 = vadd.f32 %v1988_v14, %v1982_v13 }
0x1591   : > { %v1976_v12 = vmul.f32 %v2818_v10, %v1952_v48  ;;  %v2216_v10 = vrot.slane %v3277_v25, %v1335_v46 }
0x1592   : > { %v1984_v15 = vmul.f32 %v1981_v9, %v1977_v11 }
0x1593   : > { %v1983_v16 = vmul.f32 %v1981_v9, %v1976_v12  ;;  %v2118_v9 = vrot.slane %v3277_v25, %v1235_v42 }
0x1594   : > { %v1991_v17 = vadd.f32 %v1988_v14, %v1984_v15 }
0x1595   : > { %v1990_v18 = vadd.f32 %v1988_v14, %v1983_v16 }
0x1596   : > { %v1993_v20 = vpack.c.bf16 %v1991_v17, %v1991_v17 }
0x1597   : > { %v1992_v19 = vpack.c.bf16 %v1990_v18, %v1989_v32 }
0x1599   : > { %2627 = vmatprep.mubr.msk.bf16.mxu1 %vm461_vm3, %v1992_v19 }
0x159a   : > { %2628 = vmatmul.mubr.msk.bf16.vlgmr.msra.gmra.mrb[28].mxu1 %vm461_vm3, %v1993_v20 }
0x166d   : > { %v2629_v33 = vpop.f32.mrb[28].mxu1 }
0x166e   : > { %v2064_v43 = vadd.f32 %v2629_v33, %v2002_v5  ;;  %v2055_v35 = vpop.f32.mrb[29].mxu1 }
0x166f   : > { %v2056_v37 = vadd.f32 %v2055_v35, %v2002_v5  ;;  %v2630_v44 = vpop.f32.mrb[30].mxu1 }
0x1670   : > { %v2074_v38 = vmul.f32 0.044715, %v2064_v43  ;;  %v2058_v39 = vpop.f32.mrb[31].mxu1  ;;  %v2071_v0 = vmul.f32 0.5, %v2064_v43 }
0x1671   : > { %v2072_v3 = vmul.f32 0.044715, %v2056_v37  ;;  %v2059_v40 = vadd.f32 %v2058_v39, %v2002_v5  ;;  %v2069_v2 = vmul.f32 0.5, %v2056_v37 }
0x1672   : > { %v2077_v59 = vmul.f32 %v2074_v38, %v2064_v43 }
0x1673   : > { %v2075_v41 = vmul.f32 %v2072_v3, %v2056_v37  ;;  %v2073_v47 = vmul.f32 0.044715, %v2059_v40  ;;  %v2070_v56 = vmul.f32 0.5, %v2059_v40 }
0x1674   : > { %v2080_v48 = vmul.f32 %v2077_v59, %v2064_v43 }
0x1675   : > { %v2078_v49 = vmul.f32 %v2075_v41, %v2056_v37  ;;  %v2076_v50 = vmul.f32 %v2073_v47, %v2059_v40 }
0x1676   : > { %v2083_v30 = vadd.f32 %v2080_v48, %v2064_v43 }
0x1677   : > { %v2079_v62 = vmul.f32 %v2076_v50, %v2059_v40  ;;  %v2081_v51 = vadd.f32 %v2078_v49, %v2056_v37 }
0x1678   : > { %v2086_v52 = vmul.f32 0.7978846, %v2083_v30 }
0x1679   : > { %v2082_v6 = vadd.f32 %v2079_v62, %v2059_v40  ;;  %v2084_v1 = vmul.f32 0.7978846, %v2081_v51 }
0x167a   : > { %2819 = vtanh.f32 %v2086_v52 }
0x167b   : > { %v2085_v53 = vmul.f32 0.7978846, %v2082_v6  ;;  %2821 = vtanh.f32 %v2084_v1 }
0x167d   : > { %2823 = vtanh.f32 %v2085_v53 }
0x1684   : > { %v2820_v54 = vpop.eup %2819 }
0x1685   : > { %v2822_v55 = vpop.eup %2821  ;;  %v2092_v57 = vadd.f32 1.0, %v2820_v54 }
0x1686   : > { %v2090_v61 = vadd.f32 1.0, %v2822_v55 }
0x1687   : > { %v2824_v63 = vpop.eup %2823  ;;  %v2095_v45 = vmul.f32 %v2092_v57, %v2071_v0 }
0x1688   : > { %v2091_v34 = vadd.f32 1.0, %v2824_v63  ;;  %v2093_v7 = vmul.f32 %v2090_v61, %v2069_v2 }
0x1689   : > { %v2097_v8 = vpack.c.bf16 %v2095_v45, %v2095_v45 }
0x168a   : > { %v2094_v60 = vmul.f32 %v2091_v34, %v2070_v56 }
0x168c   : > { %v2096_v58 = vpack.c.bf16 %v2094_v60, %v2093_v7 }
0x168e   : > { %2647 = vmatprep.mubr.bf16.mxu0 %v2096_v58 }
0x168f   : > { %2648 = vmatmul.mubr.bf16.vlgmr.msra.gmra.mrb[32].mxu0 %v2097_v8 }
0x1762   : > { %v2649_v27 = vpop.f32.mrb[32].mxu0 }
0x1763   : > { %v2201_v11 = vpop.f32.mrb[33].mxu0 }
0x1764   : > { %v2202_v12 = vadd.f32 %v2201_v11, %v2118_v9  ;;  %v2650_v13 = vpop.f32.mrb[34].mxu0 }
0x1765   : > { %v2204_v14 = vpop.f32.mrb[35].mxu0 }
0x1766   : > { %v2217_v15 = vmul.f32 %v2216_v10, %v2202_v12 }
0x1768   : > { %v2218_v16 = vadd.f32 %v2217_v15, %v3383_v31  ;;  %v2827_v31 = vld [vmem:[%s3497_s2] sm:$0xf] }
0x1769   : > { %v2234_v26 = vrot.slane %v2827_v31, 2  ;;  %v2237_v21 = vrot.slane %v2827_v31, 3 }
0x176a   : > { %v2220_v17 = vsel %vm2219_vm10, %v2218_v16, 0.0 }
0x176b   : > { %2221 = vadd.xlane.f32.xlu0 %v2220_v17 }
0x17f8   : > { %v2222_v32 = vpop.xlane.xlu0 %2221 }
0x17f9   : > { %v2223_v42 = vmul.f32 0.03125, %v2222_v32 }
0x17fb   : > { %v2224_v18 = vsub.f32 %v2218_v16, %v2223_v42 }
0x17fd   : > { %v2225_v20 = vmul.f32 %v2224_v18, %v2224_v18 }
0x17ff   : > { %v2226_v4 = vsel %vm2219_vm10, %v2225_v20, 0.0 }
0x1800   : > { %2227 = vadd.xlane.f32.xlu1 %v2226_v4 }
0x188d   : > { %v2228_v46 = vpop.xlane.xlu1 %2227 }
0x188e   : > { %v2229_v25 = vmul.f32 0.03125, %v2228_v46 }
0x1890   : > { %v2230_v19 = vadd.f32 1e-06, %v2229_v25 }
0x1892   : > { %2825 = vrsqrt.f32 %v2230_v19 }
0x189c   : > { %v2826_v29 = vpop.eup %2825 }
0x189d   : > { %v2232_v36 = vmul.f32 %v2826_v29, %v2224_v18 }
0x189f   : > { %v2236_v22 = vmul.f32 %v2234_v26, %v2232_v36 }
0x18a1   : > { %v2239_v23 = vadd.f32 %v2237_v21, %v2236_v22 }
0x18a3   : > { %2240 = vst.msk [vmem:[%s324_s22] sm:$0x1] %vm2219_vm10, %v2239_v23 }
0x18a4   : > { %2841 = shalt.err (!%p2838_p3)
}
0x18a5   : > { %s2842_s26 = scalar_lea.hbm %s3452_s28, 16  ;;  %s2846_s22 = scalar_lea.hbm %s3504_s9, 32 }
0x18a6   : > { %p2843_p4 = scmp.ne.s32.totalorder %s3452_s28, %s2842_s26  ;;  %p2847_p9 = scmp.lt.u32.totalorder %s3452_s28, %s3504_s9 }
0x18a7   : > { %p2848_p10 = scmp.lt.u32.totalorder %s2846_s22, %s2842_s26  ;;  %p2850_p12 = scmp.lt.u32.totalorder %s2842_s26, %s3452_s28 }
0x18a8   : > { %p2844_p7 = pnand %p2843_p4, %p2988_p5 }
0x18a9   : > { %p2849_p11 = por %p2848_p10, %p2847_p9 }
0x18aa   : > { %p2845_p8 = pneg %p2844_p7 }
0x18ab   : > { %p2851_p13 = por %p2850_p12, %p2849_p11 }
0x18ad   : > { %p2852_p0 = pnand %p2851_p13, %p2845_p8 }
0x18af   : > { %2855 = shalt.err (!%p2852_p0)
}
0x18b0   : > { %2664 = dma.vmem_to_hbm [thread:$0]  (%p2988_p5), %s3454_s23, 16, %s3452_s28, %s2242_s21  }
0x18b1 PF: > { %p2670_p1 = scmp.ge.s32.totalorder %s2890_s12, 2  ;;  %s2266_s24 = sand.u32 1, %s2878_s30  }
0x18b2   : > { %s2267_s13 = scalar_lea.sflag [#allocation5], %s2266_s24 }
0x18b3   : > { %p2667_p2 = pnand %p2670_p1, %p2992_p6 }
0x18b5   : > { %2873 = dma.done.wait (!%p2667_p2), %s2267_s13, 16  }
0x18b6   : > { %2875 = vsyncadd (!%p2667_p2), %s2267_s13, 4294967280  ;;  %p19_p3 = scmp.ge.s32.totalorder %s2975_s15, 4   ;;  %s3513_s30 = smov %s2882_s10 }
0x18b7   : > { %s3514_s10 = smov %s2886_s11  ;;  %s3515_s11 = smov %s2986_s18 }
0x18b8   : > { %s3516_s12 = smov %s2975_s15  ;;  %21 = sbr.rel (!%p19_p3) target bundleno = 3 (0x3), region = 96 }
0x18bf   :  { %2271 = vsyncpa [#allocation5], 1 }
0x18c0   :  { %2273 = vsyncpa [#allocation5 + $0x1], 1 }

</bundles_post_ra>
